<compile_context>
chip_gen: v7x
topology: tpu7x:2x2x1
jax: 0.10.0
libtpu: 0.0.40
codegen_flags: <defaults>
</compile_context>

<pallas_src>
import jax
import jax.numpy as jnp
from jax.experimental import pallas as pl
from jax.experimental.pallas import tpu as pltpu


# ---------------------------------------------------------------------------
# Kernel
# ---------------------------------------------------------------------------
def se_block_kernel(x_ref, wd_ref, bd_ref, wu_ref, bu_ref, o_ref):
    """Fused SE block on a lane-dense (rows, C*H*W) tile.

    x_ref  : (bn, CHW)       input activations, native dtype (CHW = C*H*W)
    wd_ref : (CHW, INTERNAL) down 1x1-conv weight with avg-pool folded in
    bd_ref : (1, INTERNAL)   down bias (f32)
    wu_ref : (INTERNAL, CHW) up 1x1-conv weight expanded to the spatial layout
    bu_ref : (1, CHW)        up bias expanded to the spatial layout (f32)
    o_ref  : (bn, CHW)       output
    """
    x = x_ref[...]                                   # native dtype, no f32 copy of the tile

    # avg_pool2d(., 2) + down 1x1 conv (+bias); pooling is folded into wd.
    h = jnp.dot(x, wd_ref[...],
                preferred_element_type=jnp.float32) + bd_ref[...]    # (bn, INTERNAL) f32
    # leaky_relu, PyTorch default negative_slope = 0.01
    h = jnp.where(h > 0, h, 0.01 * h)

    # up 1x1 conv (+bias) written directly in the spatially-repeated layout,
    # then sigmoid (EUP).
    s = jnp.dot(h.astype(wu_ref.dtype), wu_ref[...],
                preferred_element_type=jnp.float32) + bu_ref[...]    # (bn, CHW) f32
    s = jax.nn.sigmoid(s)

    # repeat-over-spatial + elementwise multiply (repeat already folded into wu).
    o_ref[...] = (x * s.astype(x.dtype)).astype(o_ref.dtype)


# ---------------------------------------------------------------------------
# Block-size / compiler-param selection
# ---------------------------------------------------------------------------
def _row_multiple(dtype):
    # Sublane packing: a (rows, lanes) block needs rows % {8,16,32} == 0 for
    # {4,2,1}-byte dtypes unless the block spans the full array extent.
    return {4: 8, 2: 16, 1: 32}.get(jnp.dtype(dtype).itemsize, 8)


def _choose_block_rows(n_rows, chw, dtype, vmem_budget_bytes=20 << 20):
    """Largest bandwidth-friendly row block that fits a conservative VMEM budget."""
    db = jnp.dtype(dtype).itemsize
    mult = _row_multiple(dtype)
    # VMEM per block row: double-buffered in + out tiles (native dtype) plus
    # the f32 sigmoid intermediate and one temp copy of the tile.
    per_row = 4 * chw * db + 4 * chw + chw * db
    cap = max(mult, int(vmem_budget_bytes // per_row))
    if n_rows <= cap:
        return n_rows                        # single block: one DMA in, one DMA out
    cap = (cap // mult) * mult
    for bn in range(cap, 0, -mult):          # largest pad-free divisor of n_rows
        if n_rows % bn == 0:
            return bn
    return cap                               # no pad-free tiling: caller pads (rare)


def _dimension_semantics(num_steps):
    try:
        kind = jax.devices()[0].device_kind.lower()
    except Exception:
        kind = ""
    # v7x has 2 TensorCores per chip; only CORE_PARALLEL actually shards a grid
    # axis across them.  Single-TC chips (v5e/v6e) keep the harmless hint.
    if num_steps > 1 and num_steps % 2 == 0 and ("v7" in kind or "tpu7" in kind):
        return (pltpu.CORE_PARALLEL,)
    return ("parallel",)


# ---------------------------------------------------------------------------
# Wrapper
# ---------------------------------------------------------------------------
def se_block(x_nchw, w_down, b_down, w_up, b_up, *, max_block_rows=None,
             donate_input=False):
    """x_nchw: (N, C, H, W);  w_down: (INTERNAL, C, 1, 1);  w_up: (C, INTERNAL, 1, 1)."""
    N, C, H, W = x_nchw.shape
    assert H == 2 and W == 2, (
        "SEBlock's repeat+multiply only broadcasts when avg_pool2d(., 2) yields "
        "a 1x1 map, i.e. the spatial input must be 2x2")
    internal = w_down.shape[0]
    hw = H * W
    chw = C * hw            # lane axis; choose C so C*H*W % 128 == 0 for
                            # unmasked (lane-dense) vector loads/stores
    dtype = x_nchw.dtype
    db = jnp.dtype(dtype).itemsize

    # --- free layout: row-major NCHW flatten, no transpose / HBM round-trip ---
    x2d = x_nchw.reshape(N, chw)                 # flat index = c*HW + (h*W + w)

    # --- fold avg-pool into down weight, spatial repeat into up weight/bias ---
    wd = w_down.reshape(internal, C)                                       # (I, C)
    wd_fused = (jnp.repeat(wd.T, hw, axis=0) / hw).astype(dtype)           # (CHW, I)
    wu = w_up.reshape(C, internal)                                         # (C, I)
    wu_exp = jnp.repeat(wu.T, hw, axis=1).astype(dtype)                    # (I, CHW)
    bd2 = b_down.reshape(1, internal).astype(jnp.float32)                  # (1, I)
    bu_exp = jnp.repeat(b_up, hw).reshape(1, chw).astype(jnp.float32)      # (1, CHW)

    # --- row blocking: single block when it fits, else largest pad-free tile ---
    bn = _choose_block_rows(N, chw, dtype)
    if max_block_rows is not None and max_block_rows < bn:
        mult = _row_multiple(dtype)
        bn = max(mult, (max_block_rows // mult) * mult)
    n_pad = -N % bn                              # 0 on the common path
    if n_pad:                                    # only when no pad-free tiling exists
        x2d = jnp.pad(x2d, ((0, n_pad), (0, 0)))
    n_rows = N + n_pad
    grid = (n_rows // bn,)

    weight_bytes = (2 * chw * internal) * db + (internal + chw) * 4
    cost = pl.CostEstimate(
        flops=4 * N * chw * internal + 4 * N * chw,   # two tiny matmuls + epilogue
        transcendentals=N * chw,                      # sigmoid
        bytes_accessed=2 * N * chw * db + weight_bytes)

    out2d = pl.pallas_call(
        se_block_kernel,
        out_shape=jax.ShapeDtypeStruct((n_rows, chw), dtype),
        grid=grid,
        in_specs=[
            pl.BlockSpec((bn, chw), lambda i: (i, 0)),        # x tiles: auto double-buffered
            pl.BlockSpec((chw, internal), lambda i: (0, 0)),  # weights/biases: constant block,
            pl.BlockSpec((1, internal), lambda i: (0, 0)),    # fetched once, resident in VMEM
            pl.BlockSpec((internal, chw), lambda i: (0, 0)),
            pl.BlockSpec((1, chw), lambda i: (0, 0)),
        ],
        out_specs=pl.BlockSpec((bn, chw), lambda i: (i, 0)),
        compiler_params=pltpu.CompilerParams(
            dimension_semantics=_dimension_semantics(grid[0]),
            # Blocks are budgeted to ~20 MiB; 32 MiB scoped VMEM is safe on all
            # generations (v5e/v6e 128 MiB physical, v7x 64 MiB) and above
            # v5e's 16 MiB default.
            vmem_limit_bytes=32 * 1024 * 1024,
        ),
        cost_estimate=cost,
        # Optional buffer donation (x2d -> out).  Off by default: when x is a
        # live, undonated entry parameter XLA would insert a defensive copy,
        # costing an extra HBM pass.
        input_output_aliases=({0: 0} if donate_input else {}),
    )(x2d, wd_fused, bd2, wu_exp, bu_exp)

    out = out2d if n_pad == 0 else out2d[:N]
    return out.reshape(N, C, H, W)


# ---------------------------------------------------------------------------
# Pure-JAX reference (mirrors the PyTorch forward for the valid 2x2 case)
# ---------------------------------------------------------------------------
def se_block_reference(x, w_down, b_down, w_up, b_up):
    N, C, H, W = x.shape
    internal = w_down.shape[0]
    pooled = jnp.mean(x, axis=(2, 3))                               # (N, C)
    h = pooled @ w_down.reshape(internal, C).T + b_down             # (N, INTERNAL)
    h = jnp.where(h > 0, h, 0.01 * h)
    s = jax.nn.sigmoid(h @ w_up.reshape(C, internal).T + b_up)      # (N, C)
    return x * s[:, :, None, None]


if __name__ == "__main__":
    # Deterministic synthetic parameters / inputs.  Spatial must be 2x2 (see
    # note above); C chosen so C*H*W == 128 (lane-dense loads/stores); N=512
    # fits the VMEM budget, so the kernel runs as a single block (grid=(1,)),
    # exactly the small-batch fast path the review asked for.
    N, C, H, W = 512, 32, 2, 2
    INTERNAL = 8

    key = jax.random.PRNGKey(0)
    k_x, k_wd, k_bd, k_wu, k_bu = jax.random.split(key, 5)

    x = jax.random.normal(k_x, (N, C, H, W), dtype=jnp.float32)
    w_down = 0.1 * jax.random.normal(k_wd, (INTERNAL, C, 1, 1), dtype=jnp.float32)
    b_down = 0.1 * jax.random.normal(k_bd, (INTERNAL,), dtype=jnp.float32)
    w_up = 0.1 * jax.random.normal(k_wu, (C, INTERNAL, 1, 1), dtype=jnp.float32)
    b_up = 0.1 * jax.random.normal(k_bu, (C,), dtype=jnp.float32)

    se_block_jit = jax.jit(se_block)
    out = jax.block_until_ready(se_block_jit(x, w_down, b_down, w_up, b_up))

    ref = se_block_reference(x, w_down, b_down, w_up, b_up)
    assert out.shape == x.shape
    assert jnp.allclose(out, ref, atol=1e-5, rtol=1e-5), "mismatch vs reference"

    print("KERNEL_OK")
</pallas_src>

<mosaic_0001>
module attributes {stable_mosaic.version = 11 : i64} {
  func.func @se_block_kernel(%arg0: i32, %arg1: memref<512x128xf32, #tpu.memory_space<vmem>>, %arg2: memref<128x8xf32, #tpu.memory_space<vmem>>, %arg3: memref<1x8xf32, #tpu.memory_space<vmem>>, %arg4: memref<8x128xf32, #tpu.memory_space<vmem>>, %arg5: memref<1x128xf32, #tpu.memory_space<vmem>>, %arg6: memref<512x128xf32, #tpu.memory_space<vmem>>) attributes {dimension_semantics = [#tpu.dimension_semantics<parallel>], iteration_bounds = array<i64: 1>, scalar_prefetch = 0 : i64, scratch_operands = 0 : i64, tpu.core_type = #tpu.core_type<tc>, window_params = [{transform_indices = @transform_0, window_bounds = array<i64: 512, 128>}, {pipeline_mode = #tpu.pipeline_mode<synchronous>, transform_indices = @transform_1, window_bounds = array<i64: 128, 8>}, {pipeline_mode = #tpu.pipeline_mode<synchronous>, transform_indices = @transform_2, window_bounds = array<i64: 1, 8>}, {pipeline_mode = #tpu.pipeline_mode<synchronous>, transform_indices = @transform_3, window_bounds = array<i64: 8, 128>}, {pipeline_mode = #tpu.pipeline_mode<synchronous>, transform_indices = @transform_4, window_bounds = array<i64: 1, 128>}, {transform_indices = @transform_5, window_bounds = array<i64: 512, 128>}]} {
    %c0 = arith.constant 0 : index
    %c0_0 = arith.constant 0 : index
    %0 = vector.load %arg1[%c0, %c0_0] : memref<512x128xf32, #tpu.memory_space<vmem>>, vector<512x128xf32>
    %c0_1 = arith.constant 0 : index
    %c0_2 = arith.constant 0 : index
    %1 = vector.load %arg2[%c0_1, %c0_2] : memref<128x8xf32, #tpu.memory_space<vmem>>, vector<128x8xf32>
    %cst = arith.constant dense<0.000000e+00> : vector<512x8xf32>
    %2 = tpu.matmul %0, %1, %cst {dimension_numbers = #tpu.dot_dimension_numbers<[1], [0], [0], [1], [0, 0, 1, 1], [], []>} : vector<512x128xf32>, vector<128x8xf32>, vector<512x8xf32> -> vector<512x8xf32>
    %c0_3 = arith.constant 0 : index
    %c0_4 = arith.constant 0 : index
    %3 = vector.load %arg3[%c0_3, %c0_4] : memref<1x8xf32, #tpu.memory_space<vmem>>, vector<1x8xf32>
    %4 = vector.broadcast %3 : vector<1x8xf32> to vector<512x8xf32>
    %5 = arith.addf %2, %4 : vector<512x8xf32>
    %cst_5 = arith.constant 0.000000e+00 : f32
    %6 = vector.broadcast %cst_5 : f32 to vector<512x8xf32>
    %7 = arith.cmpf ogt, %5, %6 : vector<512x8xf32>
    %cst_6 = arith.constant 0.00999999977 : f32
    %8 = vector.broadcast %cst_6 : f32 to vector<512x8xf32>
    %9 = arith.mulf %8, %5 : vector<512x8xf32>
    %10 = arith.select %7, %5, %9 : vector<512x8xi1>, vector<512x8xf32>
    %c0_7 = arith.constant 0 : index
    %c0_8 = arith.constant 0 : index
    %11 = vector.load %arg4[%c0_7, %c0_8] : memref<8x128xf32, #tpu.memory_space<vmem>>, vector<8x128xf32>
    %cst_9 = arith.constant dense<0.000000e+00> : vector<512x128xf32>
    %12 = tpu.matmul %10, %11, %cst_9 {dimension_numbers = #tpu.dot_dimension_numbers<[1], [0], [0], [1], [0, 0, 1, 1], [], []>} : vector<512x8xf32>, vector<8x128xf32>, vector<512x128xf32> -> vector<512x128xf32>
    %c0_10 = arith.constant 0 : index
    %c0_11 = arith.constant 0 : index
    %13 = vector.load %arg5[%c0_10, %c0_11] : memref<1x128xf32, #tpu.memory_space<vmem>>, vector<1x128xf32>
    %14 = vector.broadcast %13 : vector<1x128xf32> to vector<512x128xf32>
    %15 = arith.addf %12, %14 : vector<512x128xf32>
    %16 = arith.negf %15 : vector<512x128xf32>
    %17 = math.exp %16 : vector<512x128xf32>
    %cst_12 = arith.constant 1.000000e+00 : f32
    %18 = vector.broadcast %cst_12 : f32 to vector<512x128xf32>
    %19 = arith.addf %18, %17 : vector<512x128xf32>
    %20 = arith.divf %18, %19 : vector<512x128xf32>
    %21 = arith.mulf %0, %20 : vector<512x128xf32>
    %c0_13 = arith.constant 0 : index
    %c0_14 = arith.constant 0 : index
    %22 = vector.load %arg6[%c0_13, %c0_14] : memref<512x128xf32, #tpu.memory_space<vmem>>, vector<512x128xf32>
    tpu.vector_store %arg6[%c0_13, %c0_14], %21 {strides = array<i32>} : memref<512x128xf32, #tpu.memory_space<vmem>>, vector<512x128xf32>,
    return
  }
  func.func @transform_0(%arg0: i32) -> (i32, i32) {
    %c0_i32 = arith.constant 0 : i32
    %c0_i32_0 = arith.constant 0 : i32
    return %arg0, %c0_i32 : i32, i32
  }
  func.func @transform_1(%arg0: i32) -> (i32, i32) {
    %c0_i32 = arith.constant 0 : i32
    %c0_i32_0 = arith.constant 0 : i32
    %c0_i32_1 = arith.constant 0 : i32
    return %c0_i32, %c0_i32_0 : i32, i32
  }
  func.func @transform_2(%arg0: i32) -> (i32, i32) {
    %c0_i32 = arith.constant 0 : i32
    %c0_i32_0 = arith.constant 0 : i32
    %c0_i32_1 = arith.constant 0 : i32
    return %c0_i32, %c0_i32_0 : i32, i32
  }
  func.func @transform_3(%arg0: i32) -> (i32, i32) {
    %c0_i32 = arith.constant 0 : i32
    %c0_i32_0 = arith.constant 0 : i32
    %c0_i32_1 = arith.constant 0 : i32
    return %c0_i32, %c0_i32_0 : i32, i32
  }
  func.func @transform_4(%arg0: i32) -> (i32, i32) {
    %c0_i32 = arith.constant 0 : i32
    %c0_i32_0 = arith.constant 0 : i32
    %c0_i32_1 = arith.constant 0 : i32
    return %c0_i32, %c0_i32_0 : i32, i32
  }
  func.func @transform_5(%arg0: i32) -> (i32, i32) {
    %c0_i32 = arith.constant 0 : i32
    %c0_i32_0 = arith.constant 0 : i32
    return %arg0, %c0_i32 : i32, i32
  }
}

</mosaic_0001>

<bundles_post_ra>
// kernel: se_block.1
= control target key start
LH: loop header
LB: loop body
LE: loop exit
PB: predicated region body
PF: predicated region fallthrough
CT: control target
= control target key end

     0   :  { %vm692_vm2 = vcmask 64512   ;;  %s3496_s1 = inlined_call_operand.vmem [shape: f32[128,8], index: 1, kind: input, shape index: {}]   ;;  %s3497_s0 = inlined_call_operand.vmem [shape: f32[512,128], index: 0, kind: input, shape index: {}]   ;;  %s3498_s3 = inlined_call_operand.vmem [shape: f32[8,128], index: 3, kind: input, shape index: {}]   ;;  %s3499_s2 = inlined_call_operand.vmem [shape: f32[1,8], index: 2, kind: input, shape index: {}]   ;;  %s3500_s4 = inlined_call_operand.vmem [shape: f32[1,128], index: 4, kind: input, shape index: {}]   ;;  %s3501_s5 = inlined_call_operand.vmem [shape: f32[512,128], index: 5, kind: output, shape index: {}]  }
   0x1   :  { %v84_v0 = vld [vmem:[%s3496_s1] sm:$0xff]  ;;  %v85_v1 = vld [vmem:[%s3496_s1 + $0x8] sm:$0xff]  ;;  %v86_v2 = vld [vmem:[%s3496_s1 + $0x10] sm:$0xff] }
   0x2   :  { %v2287_v3 = vpack.c.bf16 %v85_v1, %v84_v0  ;;  %v87_v4 = vld [vmem:[%s3496_s1 + $0x18] sm:$0xff]  ;;  %v88_v6 = vld [vmem:[%s3496_s1 + $0x20] sm:$0xff]  ;;  %v89_v7 = vld [vmem:[%s3496_s1 + $0x28] sm:$0xff] }
   0x3   :  { %v2291_v5 = vpack.c.bf16 %v87_v4, %v86_v2  ;;  %v2295_v8 = vpack.c.bf16 %v89_v7, %v88_v6  ;;  %v20_v9 = vld [vmem:[%s3497_s0] sm:$0xff]  ;;  %v90_v10 = vld [vmem:[%s3496_s1 + $0x30] sm:$0xff]  ;;  %v91_v11 = vld [vmem:[%s3496_s1 + $0x38] sm:$0xff] }
   0x4   :  { %2288 = vmatprep.subr.bf16.mxu0 %v2287_v3  ;;  %2093 = vmatprep.mubr.f32.mxu0 %v20_v9  ;;  %v2299_v12 = vpack.c.bf16 %v91_v11, %v90_v10  ;;  %v92_v13 = vld [vmem:[%s3496_s1 + $0x40] sm:$0xff]  ;;  %v93_v14 = vld [vmem:[%s3496_s1 + $0x48] sm:$0xff]  ;;  %v94_v16 = vld [vmem:[%s3496_s1 + $0x50] sm:$0xff] }
   0x5   :  { %2290 = vmatpush3.bf16.msra.mxu0 %v2287_v3  ;;  %v2303_v15 = vpack.c.bf16 %v93_v14, %v92_v13  ;;  %v95_v17 = vld [vmem:[%s3496_s1 + $0x58] sm:$0xff]  ;;  %v96_v19 = vld [vmem:[%s3496_s1 + $0x60] sm:$0xff]  ;;  %v97_v20 = vld [vmem:[%s3496_s1 + $0x68] sm:$0xff] }
   0x6   :  { %2292 = vmatprep.subr.bf16.mxu0 %v2291_v5  ;;  %v2307_v18 = vpack.c.bf16 %v95_v17, %v94_v16  ;;  %v2311_v21 = vpack.c.bf16 %v97_v20, %v96_v19  ;;  %v98_v22 = vld [vmem:[%s3496_s1 + $0x70] sm:$0xff]  ;;  %v99_v23 = vld [vmem:[%s3496_s1 + $0x78] sm:$0xff]  ;;  %v21_v25 = vld [vmem:[%s3497_s0 + $0x8] sm:$0xff] }
   0x7   :  { %v2315_v24 = vpack.c.bf16 %v99_v23, %v98_v22  ;;  %v22_v26 = vld [vmem:[%s3497_s0 + $0x10] sm:$0xff]  ;;  %v23_v27 = vld [vmem:[%s3497_s0 + $0x18] sm:$0xff]  ;;  %v24_v28 = vld [vmem:[%s3497_s0 + $0x20] sm:$0xff] }
   0x8   :  { %v25_v29 = vld [vmem:[%s3497_s0 + $0x28] sm:$0xff]  ;;  %v26_v30 = vld [vmem:[%s3497_s0 + $0x30] sm:$0xff]  ;;  %v27_v31 = vld [vmem:[%s3497_s0 + $0x38] sm:$0xff] }
   0x9   :  { %2294 = vmatpush3.bf16.msra.mxu0 %v2291_v5  ;;  %v28_v32 = vld [vmem:[%s3497_s0 + $0x40] sm:$0xff]  ;;  %v29_v33 = vld [vmem:[%s3497_s0 + $0x48] sm:$0xff]  ;;  %v30_v34 = vld [vmem:[%s3497_s0 + $0x50] sm:$0xff] }
   0xa   :  { %2296 = vmatprep.subr.bf16.mxu0 %v2295_v8  ;;  %v31_v35 = vld [vmem:[%s3497_s0 + $0x58] sm:$0xff]  ;;  %v32_v36 = vld [vmem:[%s3497_s0 + $0x60] sm:$0xff]  ;;  %v33_v37 = vld [vmem:[%s3497_s0 + $0x68] sm:$0xff] }
   0xb   :  { %v34_v38 = vld [vmem:[%s3497_s0 + $0x70] sm:$0xff]  ;;  %v35_v39 = vld [vmem:[%s3497_s0 + $0x78] sm:$0xff]  ;;  %v36_v40 = vld [vmem:[%s3497_s0 + $0x80] sm:$0xff] }
   0xc   :  { %v37_v41 = vld [vmem:[%s3497_s0 + $0x88] sm:$0xff]  ;;  %v38_v42 = vld [vmem:[%s3497_s0 + $0x90] sm:$0xff]  ;;  %v39_v43 = vld [vmem:[%s3497_s0 + $0x98] sm:$0xff] }
   0xd   :  { %2298 = vmatpush3.bf16.msra.mxu0 %v2295_v8  ;;  %v40_v44 = vld [vmem:[%s3497_s0 + $0xa0] sm:$0xff]  ;;  %v41_v45 = vld [vmem:[%s3497_s0 + $0xa8] sm:$0xff]  ;;  %v42_v46 = vld [vmem:[%s3497_s0 + $0xb0] sm:$0xff] }
   0xe   :  { %2300 = vmatprep.subr.bf16.mxu0 %v2299_v12  ;;  %v43_v47 = vld [vmem:[%s3497_s0 + $0xb8] sm:$0xff]  ;;  %v44_v48 = vld [vmem:[%s3497_s0 + $0xc0] sm:$0xff]  ;;  %v45_v49 = vld [vmem:[%s3497_s0 + $0xc8] sm:$0xff] }
   0xf   :  { %v46_v50 = vld [vmem:[%s3497_s0 + $0xd0] sm:$0xff]  ;;  %v47_v51 = vld [vmem:[%s3497_s0 + $0xd8] sm:$0xff]  ;;  %v48_v52 = vld [vmem:[%s3497_s0 + $0xe0] sm:$0xff] }
  0x10   :  { %v49_v53 = vld [vmem:[%s3497_s0 + $0xe8] sm:$0xff]  ;;  %v50_v54 = vld [vmem:[%s3497_s0 + $0xf0] sm:$0xff]  ;;  %v51_v55 = vld [vmem:[%s3497_s0 + $0xf8] sm:$0xff] }
  0x11   :  { %2302 = vmatpush3.bf16.msra.mxu0 %v2299_v12  ;;  %v52_v56 = vld [vmem:[%s3497_s0 + $0x100] sm:$0xff]  ;;  %v53_v57 = vld [vmem:[%s3497_s0 + $0x108] sm:$0xff]  ;;  %v54_v58 = vld [vmem:[%s3497_s0 + $0x110] sm:$0xff] }
  0x12   :  { %2304 = vmatprep.subr.bf16.mxu0 %v2303_v15  ;;  %v55_v59 = vld [vmem:[%s3497_s0 + $0x118] sm:$0xff]  ;;  %v56_v60 = vld [vmem:[%s3497_s0 + $0x120] sm:$0xff]  ;;  %v57_v61 = vld [vmem:[%s3497_s0 + $0x128] sm:$0xff] }
  0x13   :  { %v58_v62 = vld [vmem:[%s3497_s0 + $0x130] sm:$0xff]  ;;  %v59_v63 = vld [vmem:[%s3497_s0 + $0x138] sm:$0xff]  ;;  %v60_v0 = vld [vmem:[%s3497_s0 + $0x140] sm:$0xff] }
  0x14   :  { %v61_v1 = vld [vmem:[%s3497_s0 + $0x148] sm:$0xff]  ;;  %v62_v2 = vld [vmem:[%s3497_s0 + $0x150] sm:$0xff]  ;;  %v63_v3 = vld [vmem:[%s3497_s0 + $0x158] sm:$0xff] }
  0x15   :  { %2306 = vmatpush3.bf16.msra.mxu0 %v2303_v15  ;;  %v64_v4 = vld [vmem:[%s3497_s0 + $0x160] sm:$0xff]  ;;  %v65_v5 = vld [vmem:[%s3497_s0 + $0x168] sm:$0xff]  ;;  %v66_v6 = vld [vmem:[%s3497_s0 + $0x170] sm:$0xff] }
  0x16   :  { %2308 = vmatprep.subr.bf16.mxu0 %v2307_v18  ;;  %v684_v7 = vld [vmem:[%s3498_s3] sm:$0xff]  ;;  %v67_v8 = vld [vmem:[%s3497_s0 + $0x178] sm:$0xff]  ;;  %v69_v10 = vld [vmem:[%s3497_s0 + $0x188] sm:$0xff] }
  0x17   :  { %2189 = vmatprep.subr.mxu1 %v684_v7  ;;  %v68_v9 = vld [vmem:[%s3497_s0 + $0x180] sm:$0xff]  ;;  %v70_v11 = vld [vmem:[%s3497_s0 + $0x190] sm:$0xff]  ;;  %v71_v12 = vld [vmem:[%s3497_s0 + $0x198] sm:$0xff] }
  0x18   :  { %2190 = vmatpush3.msra.mxu1 %v684_v7  ;;  %v72_v13 = vld [vmem:[%s3497_s0 + $0x1a0] sm:$0xff]  ;;  %v73_v14 = vld [vmem:[%s3497_s0 + $0x1a8] sm:$0xff]  ;;  %v74_v15 = vld [vmem:[%s3497_s0 + $0x1b0] sm:$0xff] }
  0x19   :  { %2310 = vmatpush3.bf16.msra.mxu0 %v2307_v18  ;;  %v75_v16 = vld [vmem:[%s3497_s0 + $0x1b8] sm:$0xff]  ;;  %v76_v17 = vld [vmem:[%s3497_s0 + $0x1c0] sm:$0xff]  ;;  %v77_v18 = vld [vmem:[%s3497_s0 + $0x1c8] sm:$0xff] }
  0x1a   :  { %2312 = vmatprep.subr.bf16.mxu0 %v2311_v21  ;;  %v78_v19 = vld [vmem:[%s3497_s0 + $0x1d0] sm:$0xff]  ;;  %v79_v20 = vld [vmem:[%s3497_s0 + $0x1d8] sm:$0xff]  ;;  %v81_v22 = vld [vmem:[%s3497_s0 + $0x1e8] sm:$0xff] }
  0x1b   :  { %v82_v23 = vld [vmem:[%s3497_s0 + $0x1f0] sm:$0xff] }
  0x1d   :  { %2314 = vmatpush3.bf16.msra.mxu0 %v2311_v21  ;;  %v80_v21 = vld [vmem:[%s3497_s0 + $0x1e0] sm:$0xff] }
  0x1e   :  { %2316 = vmatprep.subr.bf16.mxu0 %v2315_v24 }
  0x21   :  { %2318 = vmatpush3.bf16.msra.mxu0 %v2315_v24  ;;  %v83_v24 = vld [vmem:[%s3497_s0 + $0x1f8] sm:$0xff] }
  0x24   :  { %2094 = vmatmul.mubr.f32.vlgmr.msra.gmra.mrb[0].mxu0 %v21_v25  ;;  %v2916_v25 = vld [vmem:[%s3499_s2] ss:$0 sm:$0xff] }
  0x25   :  { %2096 = vmatprep.mubr.f32.mxu0 %v22_v26 }
  0x28   :  { %2097 = vmatmul.mubr.f32.gmra.mrb[2].mxu0 %v23_v27 }
  0x29   :  { %2099 = vmatprep.mubr.f32.mxu0 %v24_v28 }
  0x2c   :  { %2100 = vmatmul.mubr.f32.gmra.mrb[4].mxu0 %v25_v29 }
  0x2d   :  { %2102 = vmatprep.mubr.f32.mxu0 %v26_v30 }
  0x30   :  { %2103 = vmatmul.mubr.f32.gmra.mrb[6].mxu0 %v27_v31 }
  0x31   :  { %2105 = vmatprep.mubr.f32.mxu0 %v28_v32 }
  0x34   :  { %2106 = vmatmul.mubr.f32.gmra.mrb[8].mxu0 %v29_v33 }
  0x35   :  { %2108 = vmatprep.mubr.f32.mxu0 %v30_v34 }
  0x38   :  { %2109 = vmatmul.mubr.f32.gmra.mrb[10].mxu0 %v31_v35 }
  0x39   :  { %2111 = vmatprep.mubr.f32.mxu0 %v32_v36 }
  0x3c   :  { %2112 = vmatmul.mubr.f32.gmra.mrb[12].mxu0 %v33_v37 }
  0x3d   :  { %2114 = vmatprep.mubr.f32.mxu0 %v34_v38 }
  0x40   :  { %2115 = vmatmul.mubr.f32.gmra.mrb[14].mxu0 %v35_v39 }
  0x41   :  { %2117 = vmatprep.mubr.f32.mxu0 %v36_v40 }
  0x44   :  { %2118 = vmatmul.mubr.f32.gmra.mrb[16].mxu0 %v37_v41 }
  0x45   :  { %2120 = vmatprep.mubr.f32.mxu0 %v38_v42 }
  0x48   :  { %2121 = vmatmul.mubr.f32.gmra.mrb[18].mxu0 %v39_v43 }
  0x49   :  { %2123 = vmatprep.mubr.f32.mxu0 %v40_v44 }
  0x4c   :  { %2124 = vmatmul.mubr.f32.gmra.mrb[20].mxu0 %v41_v45 }
  0x4d   :  { %2126 = vmatprep.mubr.f32.mxu0 %v42_v46 }
  0x50   :  { %2127 = vmatmul.mubr.f32.gmra.mrb[22].mxu0 %v43_v47 }
  0x51   :  { %2129 = vmatprep.mubr.f32.mxu0 %v44_v48 }
  0x54   :  { %2130 = vmatmul.mubr.f32.gmra.mrb[24].mxu0 %v45_v49 }
  0x55   :  { %2132 = vmatprep.mubr.f32.mxu0 %v46_v50 }
  0x58   :  { %2133 = vmatmul.mubr.f32.gmra.mrb[26].mxu0 %v47_v51 }
  0x59   :  { %2135 = vmatprep.mubr.f32.mxu0 %v48_v52 }
  0x5c   :  { %2136 = vmatmul.mubr.f32.gmra.mrb[28].mxu0 %v49_v53 }
  0x5d   :  { %2138 = vmatprep.mubr.f32.mxu0 %v50_v54 }
  0x60   :  { %2139 = vmatmul.mubr.f32.gmra.mrb[30].mxu0 %v51_v55 }
  0x61   :  { %2141 = vmatprep.mubr.f32.mxu0 %v52_v56 }
  0x64   :  { %2142 = vmatmul.mubr.f32.gmra.mrb[32].mxu0 %v53_v57 }
  0x65   :  { %2144 = vmatprep.mubr.f32.mxu0 %v54_v58 }
  0x68   :  { %2145 = vmatmul.mubr.f32.gmra.mrb[34].mxu0 %v55_v59 }
  0x69   :  { %2147 = vmatprep.mubr.f32.mxu0 %v56_v60 }
  0x6c   :  { %2148 = vmatmul.mubr.f32.gmra.mrb[36].mxu0 %v57_v61 }
  0x6d   :  { %2150 = vmatprep.mubr.f32.mxu0 %v58_v62 }
  0x70   :  { %2151 = vmatmul.mubr.f32.gmra.mrb[38].mxu0 %v59_v63 }
  0x71   :  { %2153 = vmatprep.mubr.f32.mxu0 %v60_v0 }
  0x74   :  { %2154 = vmatmul.mubr.f32.gmra.mrb[40].mxu0 %v61_v1 }
  0x75   :  { %2156 = vmatprep.mubr.f32.mxu0 %v62_v2 }
  0x78   :  { %2157 = vmatmul.mubr.f32.gmra.mrb[42].mxu0 %v63_v3 }
  0x79   :  { %2159 = vmatprep.mubr.f32.mxu0 %v64_v4 }
  0x7c   :  { %2160 = vmatmul.mubr.f32.gmra.mrb[44].mxu0 %v65_v5 }
  0x7d   :  { %2162 = vmatprep.mubr.f32.mxu0 %v66_v6 }
  0x80   :  { %2163 = vmatmul.mubr.f32.gmra.mrb[46].mxu0 %v67_v8 }
  0x81   :  { %2165 = vmatprep.mubr.f32.mxu0 %v68_v9 }
  0x84   :  { %2166 = vmatmul.mubr.f32.gmra.mrb[48].mxu0 %v69_v10 }
  0x85   :  { %2168 = vmatprep.mubr.f32.mxu0 %v70_v11 }
  0x88   :  { %2169 = vmatmul.mubr.f32.gmra.mrb[50].mxu0 %v71_v12 }
  0x89   :  { %2171 = vmatprep.mubr.f32.mxu0 %v72_v13 }
  0x8c   :  { %2172 = vmatmul.mubr.f32.gmra.mrb[52].mxu0 %v73_v14 }
  0x8d   :  { %2174 = vmatprep.mubr.f32.mxu0 %v74_v15 }
  0x90   :  { %2175 = vmatmul.mubr.f32.gmra.mrb[54].mxu0 %v75_v16 }
  0x91   :  { %2177 = vmatprep.mubr.f32.mxu0 %v76_v17 }
  0x94   :  { %2178 = vmatmul.mubr.f32.gmra.mrb[56].mxu0 %v77_v18 }
  0x95   :  { %2180 = vmatprep.mubr.f32.mxu0 %v78_v19 }
  0x98   :  { %2181 = vmatmul.mubr.f32.gmra.mrb[58].mxu0 %v79_v20 }
  0x99   :  { %2183 = vmatprep.mubr.f32.mxu0 %v80_v21 }
  0x9c   :  { %2184 = vmatmul.mubr.f32.gmra.mrb[60].mxu0 %v81_v22 }
  0x9d   :  { %2186 = vmatprep.mubr.f32.mxu0 %v82_v23 }
  0xa0   :  { %2187 = vmatmul.mubr.f32.gmra.mrb[62].mxu0 %v83_v24 }
  0xf7   :  { %v2095_v26 = vpop.f32.mrb[0].mxu0 }
  0xf8   :  { %v179_v27 = vadd.f32 %v2095_v26, %v2916_v25  ;;  %v173_v28 = vpop.f32.mrb[1].mxu0 }
  0xf9   :  { %v174_v29 = vadd.f32 %v2916_v25, %v173_v28 }
  0xfa   :  { %v557_v30 = vmul.f32 0.01, %v179_v27  ;;  %vm493_vm0 = vcmp.gt.f32.partialorder %v179_v27, 0.0 }
  0xfb   :  { %v2098_v31 = vpop.f32.mrb[2].mxu0  ;;  %vm492_vm1 = vcmp.gt.f32.partialorder %v174_v29, 0.0  ;;  %v556_v32 = vmul.f32 0.01, %v174_v29 }
  0xfc   :  { %v189_v33 = vadd.f32 %v2098_v31, %v2916_v25  ;;  %v183_v34 = vpop.f32.mrb[3].mxu0  ;;  %v621_v38 = vsel %vm493_vm0, %v179_v27, %v557_v30 }
  0xfd   :  { %v184_v35 = vadd.f32 %v2916_v25, %v183_v34  ;;  %v620_v36 = vsel %vm492_vm1, %v174_v29, %v556_v32 }
  0xfe   :  { %v559_v37 = vmul.f32 0.01, %v189_v33  ;;  %2191 = vmatprep.mubr.msk.f32.mxu1 %vm692_vm2, %v620_v36  ;;  %vm495_vm3 = vcmp.gt.f32.partialorder %v189_v33, 0.0 }
  0xff   :  { %vm494_vm4 = vcmp.gt.f32.partialorder %v184_v35, 0.0  ;;  %v558_v39 = vmul.f32 0.01, %v184_v35  ;;  %v2101_v40 = vpop.f32.mrb[4].mxu0  ;;  %2192 = vmatmul.mubr.msk.f32.vlgmr.msra.gmra.mrb[0].mxu1 %vm692_vm2, %v621_v38 }
 0x100   :  { %v199_v41 = vadd.f32 %v2101_v40, %v2916_v25  ;;  %v193_v42 = vpop.f32.mrb[5].mxu0  ;;  %v623_v46 = vsel %vm495_vm3, %v189_v33, %v559_v37 }
 0x101   :  { %v194_v43 = vadd.f32 %v2916_v25, %v193_v42  ;;  %v622_v44 = vsel %vm494_vm4, %v184_v35, %v558_v39 }
 0x102   :  { %v561_v45 = vmul.f32 0.01, %v199_v41  ;;  %2194 = vmatprep.mubr.msk.f32.mxu1 %vm692_vm2, %v622_v44  ;;  %vm497_vm5 = vcmp.gt.f32.partialorder %v199_v41, 0.0 }
 0x103   :  { %vm496_vm6 = vcmp.gt.f32.partialorder %v194_v43, 0.0  ;;  %v560_v47 = vmul.f32 0.01, %v194_v43  ;;  %v2104_v48 = vpop.f32.mrb[6].mxu0  ;;  %2195 = vmatmul.mubr.msk.f32.gmra.mrb[2].mxu1 %vm692_vm2, %v623_v46 }
 0x104   :  { %v209_v49 = vadd.f32 %v2104_v48, %v2916_v25  ;;  %v203_v50 = vpop.f32.mrb[7].mxu0  ;;  %v625_v54 = vsel %vm497_vm5, %v199_v41, %v561_v45 }
 0x105   :  { %v204_v51 = vadd.f32 %v2916_v25, %v203_v50  ;;  %v624_v52 = vsel %vm496_vm6, %v194_v43, %v560_v47 }
 0x106   :  { %v563_v53 = vmul.f32 0.01, %v209_v49  ;;  %2197 = vmatprep.mubr.msk.f32.mxu1 %vm692_vm2, %v624_v52  ;;  %vm499_vm7 = vcmp.gt.f32.partialorder %v209_v49, 0.0 }
 0x107   :  { %vm498_vm8 = vcmp.gt.f32.partialorder %v204_v51, 0.0  ;;  %v562_v55 = vmul.f32 0.01, %v204_v51  ;;  %v2107_v56 = vpop.f32.mrb[8].mxu0  ;;  %2198 = vmatmul.mubr.msk.f32.gmra.mrb[4].mxu1 %vm692_vm2, %v625_v54 }
 0x108   :  { %v219_v57 = vadd.f32 %v2107_v56, %v2916_v25  ;;  %v213_v58 = vpop.f32.mrb[9].mxu0  ;;  %v627_v62 = vsel %vm499_vm7, %v209_v49, %v563_v53 }
 0x109   :  { %v214_v59 = vadd.f32 %v2916_v25, %v213_v58  ;;  %v626_v60 = vsel %vm498_vm8, %v204_v51, %v562_v55 }
 0x10a   :  { %v565_v61 = vmul.f32 0.01, %v219_v57  ;;  %2200 = vmatprep.mubr.msk.f32.mxu1 %vm692_vm2, %v626_v60  ;;  %vm501_vm9 = vcmp.gt.f32.partialorder %v219_v57, 0.0 }
 0x10b   :  { %vm500_vm10 = vcmp.gt.f32.partialorder %v214_v59, 0.0  ;;  %v564_v63 = vmul.f32 0.01, %v214_v59  ;;  %v2110_v0 = vpop.f32.mrb[10].mxu0  ;;  %2201 = vmatmul.mubr.msk.f32.gmra.mrb[6].mxu1 %vm692_vm2, %v627_v62 }
 0x10c   :  { %v229_v1 = vadd.f32 %v2110_v0, %v2916_v25  ;;  %v223_v2 = vpop.f32.mrb[11].mxu0  ;;  %v629_v6 = vsel %vm501_vm9, %v219_v57, %v565_v61 }
 0x10d   :  { %v224_v3 = vadd.f32 %v2916_v25, %v223_v2  ;;  %v628_v4 = vsel %vm500_vm10, %v214_v59, %v564_v63 }
 0x10e   :  { %v567_v5 = vmul.f32 0.01, %v229_v1  ;;  %2203 = vmatprep.mubr.msk.f32.mxu1 %vm692_vm2, %v628_v4  ;;  %vm503_vm11 = vcmp.gt.f32.partialorder %v229_v1, 0.0 }
 0x10f   :  { %vm502_vm12 = vcmp.gt.f32.partialorder %v224_v3, 0.0  ;;  %v566_v7 = vmul.f32 0.01, %v224_v3  ;;  %v2113_v8 = vpop.f32.mrb[12].mxu0  ;;  %2204 = vmatmul.mubr.msk.f32.gmra.mrb[8].mxu1 %vm692_vm2, %v629_v6 }
 0x110   :  { %v239_v9 = vadd.f32 %v2113_v8, %v2916_v25  ;;  %v233_v10 = vpop.f32.mrb[13].mxu0  ;;  %v631_v14 = vsel %vm503_vm11, %v229_v1, %v567_v5 }
 0x111   :  { %v234_v11 = vadd.f32 %v2916_v25, %v233_v10  ;;  %v630_v12 = vsel %vm502_vm12, %v224_v3, %v566_v7 }
 0x112   :  { %v569_v13 = vmul.f32 0.01, %v239_v9  ;;  %2206 = vmatprep.mubr.msk.f32.mxu1 %vm692_vm2, %v630_v12  ;;  %vm505_vm13 = vcmp.gt.f32.partialorder %v239_v9, 0.0 }
 0x113   :  { %vm504_vm14 = vcmp.gt.f32.partialorder %v234_v11, 0.0  ;;  %v568_v15 = vmul.f32 0.01, %v234_v11  ;;  %v2116_v16 = vpop.f32.mrb[14].mxu0  ;;  %2207 = vmatmul.mubr.msk.f32.gmra.mrb[10].mxu1 %vm692_vm2, %v631_v14 }
 0x114   :  { %v249_v17 = vadd.f32 %v2116_v16, %v2916_v25  ;;  %v243_v18 = vpop.f32.mrb[15].mxu0  ;;  %v633_v22 = vsel %vm505_vm13, %v239_v9, %v569_v13 }
 0x115   :  { %v244_v19 = vadd.f32 %v2916_v25, %v243_v18  ;;  %v632_v20 = vsel %vm504_vm14, %v234_v11, %v568_v15 }
 0x116   :  { %v571_v21 = vmul.f32 0.01, %v249_v17  ;;  %2209 = vmatprep.mubr.msk.f32.mxu1 %vm692_vm2, %v632_v20  ;;  %vm507_vm15 = vcmp.gt.f32.partialorder %v249_v17, 0.0 }
 0x117   :  { %vm506_vm0 = vcmp.gt.f32.partialorder %v244_v19, 0.0  ;;  %v570_v23 = vmul.f32 0.01, %v244_v19  ;;  %v2119_v24 = vpop.f32.mrb[16].mxu0  ;;  %2210 = vmatmul.mubr.msk.f32.gmra.mrb[12].mxu1 %vm692_vm2, %v633_v22 }
 0x118   :  { %v259_v26 = vadd.f32 %v2119_v24, %v2916_v25  ;;  %v253_v27 = vpop.f32.mrb[17].mxu0  ;;  %v635_v31 = vsel %vm507_vm15, %v249_v17, %v571_v21 }
 0x119   :  { %v254_v28 = vadd.f32 %v2916_v25, %v253_v27  ;;  %v634_v29 = vsel %vm506_vm0, %v244_v19, %v570_v23 }
 0x11a   :  { %v573_v30 = vmul.f32 0.01, %v259_v26  ;;  %2212 = vmatprep.mubr.msk.f32.mxu1 %vm692_vm2, %v634_v29  ;;  %vm509_vm1 = vcmp.gt.f32.partialorder %v259_v26, 0.0 }
 0x11b   :  { %vm508_vm3 = vcmp.gt.f32.partialorder %v254_v28, 0.0  ;;  %v572_v32 = vmul.f32 0.01, %v254_v28  ;;  %v2122_v33 = vpop.f32.mrb[18].mxu0  ;;  %2213 = vmatmul.mubr.msk.f32.gmra.mrb[14].mxu1 %vm692_vm2, %v635_v31 }
 0x11c   :  { %v269_v34 = vadd.f32 %v2122_v33, %v2916_v25  ;;  %v263_v35 = vpop.f32.mrb[19].mxu0  ;;  %v637_v39 = vsel %vm509_vm1, %v259_v26, %v573_v30 }
 0x11d   :  { %v264_v36 = vadd.f32 %v2916_v25, %v263_v35  ;;  %v636_v37 = vsel %vm508_vm3, %v254_v28, %v572_v32 }
 0x11e   :  { %v575_v38 = vmul.f32 0.01, %v269_v34  ;;  %2215 = vmatprep.mubr.msk.f32.mxu1 %vm692_vm2, %v636_v37  ;;  %vm511_vm4 = vcmp.gt.f32.partialorder %v269_v34, 0.0 }
 0x11f   :  { %vm510_vm5 = vcmp.gt.f32.partialorder %v264_v36, 0.0  ;;  %v574_v40 = vmul.f32 0.01, %v264_v36  ;;  %v2125_v41 = vpop.f32.mrb[20].mxu0  ;;  %2216 = vmatmul.mubr.msk.f32.gmra.mrb[16].mxu1 %vm692_vm2, %v637_v39 }
 0x120   :  { %v279_v42 = vadd.f32 %v2125_v41, %v2916_v25  ;;  %v273_v43 = vpop.f32.mrb[21].mxu0  ;;  %v639_v47 = vsel %vm511_vm4, %v269_v34, %v575_v38 }
 0x121   :  { %v274_v44 = vadd.f32 %v2916_v25, %v273_v43  ;;  %v638_v45 = vsel %vm510_vm5, %v264_v36, %v574_v40 }
 0x122   :  { %v577_v46 = vmul.f32 0.01, %v279_v42  ;;  %2218 = vmatprep.mubr.msk.f32.mxu1 %vm692_vm2, %v638_v45  ;;  %vm513_vm6 = vcmp.gt.f32.partialorder %v279_v42, 0.0 }
 0x123   :  { %vm512_vm7 = vcmp.gt.f32.partialorder %v274_v44, 0.0  ;;  %v576_v48 = vmul.f32 0.01, %v274_v44  ;;  %v2128_v49 = vpop.f32.mrb[22].mxu0  ;;  %2219 = vmatmul.mubr.msk.f32.gmra.mrb[18].mxu1 %vm692_vm2, %v639_v47 }
 0x124   :  { %v289_v50 = vadd.f32 %v2128_v49, %v2916_v25  ;;  %v283_v51 = vpop.f32.mrb[23].mxu0  ;;  %v641_v55 = vsel %vm513_vm6, %v279_v42, %v577_v46 }
 0x125   :  { %v284_v52 = vadd.f32 %v2916_v25, %v283_v51  ;;  %v640_v53 = vsel %vm512_vm7, %v274_v44, %v576_v48 }
 0x126   :  { %v579_v54 = vmul.f32 0.01, %v289_v50  ;;  %2221 = vmatprep.mubr.msk.f32.mxu1 %vm692_vm2, %v640_v53  ;;  %vm515_vm8 = vcmp.gt.f32.partialorder %v289_v50, 0.0 }
 0x127   :  { %vm514_vm9 = vcmp.gt.f32.partialorder %v284_v52, 0.0  ;;  %v578_v56 = vmul.f32 0.01, %v284_v52  ;;  %v2131_v57 = vpop.f32.mrb[24].mxu0  ;;  %2222 = vmatmul.mubr.msk.f32.gmra.mrb[20].mxu1 %vm692_vm2, %v641_v55 }
 0x128   :  { %v299_v58 = vadd.f32 %v2131_v57, %v2916_v25  ;;  %v293_v59 = vpop.f32.mrb[25].mxu0  ;;  %v643_v63 = vsel %vm515_vm8, %v289_v50, %v579_v54 }
 0x129   :  { %v294_v60 = vadd.f32 %v2916_v25, %v293_v59  ;;  %v642_v61 = vsel %vm514_vm9, %v284_v52, %v578_v56 }
 0x12a   :  { %v581_v62 = vmul.f32 0.01, %v299_v58  ;;  %2224 = vmatprep.mubr.msk.f32.mxu1 %vm692_vm2, %v642_v61  ;;  %vm517_vm10 = vcmp.gt.f32.partialorder %v299_v58, 0.0 }
 0x12b   :  { %vm516_vm11 = vcmp.gt.f32.partialorder %v294_v60, 0.0  ;;  %v580_v0 = vmul.f32 0.01, %v294_v60  ;;  %v2134_v1 = vpop.f32.mrb[26].mxu0  ;;  %2225 = vmatmul.mubr.msk.f32.gmra.mrb[22].mxu1 %vm692_vm2, %v643_v63 }
 0x12c   :  { %v309_v2 = vadd.f32 %v2134_v1, %v2916_v25  ;;  %v303_v3 = vpop.f32.mrb[27].mxu0  ;;  %v645_v7 = vsel %vm517_vm10, %v299_v58, %v581_v62 }
 0x12d   :  { %v304_v4 = vadd.f32 %v2916_v25, %v303_v3  ;;  %v644_v5 = vsel %vm516_vm11, %v294_v60, %v580_v0 }
 0x12e   :  { %v583_v6 = vmul.f32 0.01, %v309_v2  ;;  %2227 = vmatprep.mubr.msk.f32.mxu1 %vm692_vm2, %v644_v5  ;;  %vm519_vm12 = vcmp.gt.f32.partialorder %v309_v2, 0.0 }
 0x12f   :  { %vm518_vm13 = vcmp.gt.f32.partialorder %v304_v4, 0.0  ;;  %v582_v8 = vmul.f32 0.01, %v304_v4  ;;  %v2137_v9 = vpop.f32.mrb[28].mxu0  ;;  %2228 = vmatmul.mubr.msk.f32.gmra.mrb[24].mxu1 %vm692_vm2, %v645_v7 }
 0x130   :  { %v319_v10 = vadd.f32 %v2137_v9, %v2916_v25  ;;  %v313_v11 = vpop.f32.mrb[29].mxu0  ;;  %v647_v15 = vsel %vm519_vm12, %v309_v2, %v583_v6 }
 0x131   :  { %v314_v12 = vadd.f32 %v2916_v25, %v313_v11  ;;  %v646_v13 = vsel %vm518_vm13, %v304_v4, %v582_v8 }
 0x132   :  { %v585_v14 = vmul.f32 0.01, %v319_v10  ;;  %2230 = vmatprep.mubr.msk.f32.mxu1 %vm692_vm2, %v646_v13  ;;  %vm521_vm14 = vcmp.gt.f32.partialorder %v319_v10, 0.0 }
 0x133   :  { %vm520_vm15 = vcmp.gt.f32.partialorder %v314_v12, 0.0  ;;  %v584_v16 = vmul.f32 0.01, %v314_v12  ;;  %v2140_v17 = vpop.f32.mrb[30].mxu0  ;;  %2231 = vmatmul.mubr.msk.f32.gmra.mrb[26].mxu1 %vm692_vm2, %v647_v15 }
 0x134   :  { %v329_v18 = vadd.f32 %v2140_v17, %v2916_v25  ;;  %v323_v19 = vpop.f32.mrb[31].mxu0  ;;  %v649_v23 = vsel %vm521_vm14, %v319_v10, %v585_v14 }
 0x135   :  { %v324_v20 = vadd.f32 %v2916_v25, %v323_v19  ;;  %v648_v21 = vsel %vm520_vm15, %v314_v12, %v584_v16 }
 0x136   :  { %v587_v22 = vmul.f32 0.01, %v329_v18  ;;  %2233 = vmatprep.mubr.msk.f32.mxu1 %vm692_vm2, %v648_v21  ;;  %vm523_vm0 = vcmp.gt.f32.partialorder %v329_v18, 0.0 }
 0x137   :  { %vm522_vm1 = vcmp.gt.f32.partialorder %v324_v20, 0.0  ;;  %v586_v24 = vmul.f32 0.01, %v324_v20  ;;  %v2143_v26 = vpop.f32.mrb[32].mxu0  ;;  %2234 = vmatmul.mubr.msk.f32.gmra.mrb[28].mxu1 %vm692_vm2, %v649_v23 }
 0x138   :  { %v339_v27 = vadd.f32 %v2143_v26, %v2916_v25  ;;  %v333_v28 = vpop.f32.mrb[33].mxu0  ;;  %v651_v32 = vsel %vm523_vm0, %v329_v18, %v587_v22 }
 0x139   :  { %v334_v29 = vadd.f32 %v2916_v25, %v333_v28  ;;  %v650_v30 = vsel %vm522_vm1, %v324_v20, %v586_v24 }
 0x13a   :  { %v589_v31 = vmul.f32 0.01, %v339_v27  ;;  %2236 = vmatprep.mubr.msk.f32.mxu1 %vm692_vm2, %v650_v30  ;;  %vm525_vm3 = vcmp.gt.f32.partialorder %v339_v27, 0.0 }
 0x13b   :  { %vm524_vm4 = vcmp.gt.f32.partialorder %v334_v29, 0.0  ;;  %v588_v33 = vmul.f32 0.01, %v334_v29  ;;  %v2146_v34 = vpop.f32.mrb[34].mxu0  ;;  %2237 = vmatmul.mubr.msk.f32.gmra.mrb[30].mxu1 %vm692_vm2, %v651_v32 }
 0x13c   :  { %v349_v35 = vadd.f32 %v2146_v34, %v2916_v25  ;;  %v343_v36 = vpop.f32.mrb[35].mxu0  ;;  %v653_v40 = vsel %vm525_vm3, %v339_v27, %v589_v31 }
 0x13d   :  { %v344_v37 = vadd.f32 %v2916_v25, %v343_v36  ;;  %v652_v38 = vsel %vm524_vm4, %v334_v29, %v588_v33 }
 0x13e   :  { %v591_v39 = vmul.f32 0.01, %v349_v35  ;;  %2239 = vmatprep.mubr.msk.f32.mxu1 %vm692_vm2, %v652_v38  ;;  %vm527_vm5 = vcmp.gt.f32.partialorder %v349_v35, 0.0 }
 0x13f   :  { %vm526_vm6 = vcmp.gt.f32.partialorder %v344_v37, 0.0  ;;  %v590_v41 = vmul.f32 0.01, %v344_v37  ;;  %v2149_v42 = vpop.f32.mrb[36].mxu0  ;;  %2240 = vmatmul.mubr.msk.f32.gmra.mrb[32].mxu1 %vm692_vm2, %v653_v40 }
 0x140   :  { %v359_v43 = vadd.f32 %v2149_v42, %v2916_v25  ;;  %v353_v44 = vpop.f32.mrb[37].mxu0  ;;  %v655_v48 = vsel %vm527_vm5, %v349_v35, %v591_v39 }
 0x141   :  { %v354_v45 = vadd.f32 %v2916_v25, %v353_v44  ;;  %v654_v46 = vsel %vm526_vm6, %v344_v37, %v590_v41 }
 0x142   :  { %v593_v47 = vmul.f32 0.01, %v359_v43  ;;  %2242 = vmatprep.mubr.msk.f32.mxu1 %vm692_vm2, %v654_v46  ;;  %vm529_vm7 = vcmp.gt.f32.partialorder %v359_v43, 0.0 }
 0x143   :  { %vm528_vm8 = vcmp.gt.f32.partialorder %v354_v45, 0.0  ;;  %v592_v49 = vmul.f32 0.01, %v354_v45  ;;  %v2152_v50 = vpop.f32.mrb[38].mxu0  ;;  %2243 = vmatmul.mubr.msk.f32.gmra.mrb[34].mxu1 %vm692_vm2, %v655_v48 }
 0x144   :  { %v369_v51 = vadd.f32 %v2152_v50, %v2916_v25  ;;  %v363_v52 = vpop.f32.mrb[39].mxu0  ;;  %v657_v56 = vsel %vm529_vm7, %v359_v43, %v593_v47 }
 0x145   :  { %v364_v53 = vadd.f32 %v2916_v25, %v363_v52  ;;  %v656_v54 = vsel %vm528_vm8, %v354_v45, %v592_v49 }
 0x146   :  { %v595_v55 = vmul.f32 0.01, %v369_v51  ;;  %2245 = vmatprep.mubr.msk.f32.mxu1 %vm692_vm2, %v656_v54  ;;  %vm531_vm9 = vcmp.gt.f32.partialorder %v369_v51, 0.0 }
 0x147   :  { %vm530_vm10 = vcmp.gt.f32.partialorder %v364_v53, 0.0  ;;  %v594_v57 = vmul.f32 0.01, %v364_v53  ;;  %v2155_v58 = vpop.f32.mrb[40].mxu0  ;;  %2246 = vmatmul.mubr.msk.f32.gmra.mrb[36].mxu1 %vm692_vm2, %v657_v56 }
 0x148   :  { %v379_v59 = vadd.f32 %v2155_v58, %v2916_v25  ;;  %v373_v60 = vpop.f32.mrb[41].mxu0  ;;  %v659_v0 = vsel %vm531_vm9, %v369_v51, %v595_v55 }
 0x149   :  { %v374_v61 = vadd.f32 %v2916_v25, %v373_v60  ;;  %v658_v62 = vsel %vm530_vm10, %v364_v53, %v594_v57 }
 0x14a   :  { %v597_v63 = vmul.f32 0.01, %v379_v59  ;;  %2248 = vmatprep.mubr.msk.f32.mxu1 %vm692_vm2, %v658_v62  ;;  %vm533_vm11 = vcmp.gt.f32.partialorder %v379_v59, 0.0 }
 0x14b   :  { %vm532_vm12 = vcmp.gt.f32.partialorder %v374_v61, 0.0  ;;  %v596_v1 = vmul.f32 0.01, %v374_v61  ;;  %v2158_v2 = vpop.f32.mrb[42].mxu0  ;;  %2249 = vmatmul.mubr.msk.f32.gmra.mrb[38].mxu1 %vm692_vm2, %v659_v0 }
 0x14c   :  { %v389_v3 = vadd.f32 %v2158_v2, %v2916_v25  ;;  %v383_v4 = vpop.f32.mrb[43].mxu0  ;;  %v661_v8 = vsel %vm533_vm11, %v379_v59, %v597_v63 }
 0x14d   :  { %v384_v5 = vadd.f32 %v2916_v25, %v383_v4  ;;  %v660_v6 = vsel %vm532_vm12, %v374_v61, %v596_v1 }
 0x14e   :  { %v599_v7 = vmul.f32 0.01, %v389_v3  ;;  %2251 = vmatprep.mubr.msk.f32.mxu1 %vm692_vm2, %v660_v6  ;;  %vm535_vm13 = vcmp.gt.f32.partialorder %v389_v3, 0.0 }
 0x14f   :  { %vm534_vm14 = vcmp.gt.f32.partialorder %v384_v5, 0.0  ;;  %v598_v9 = vmul.f32 0.01, %v384_v5  ;;  %v2161_v10 = vpop.f32.mrb[44].mxu0  ;;  %2252 = vmatmul.mubr.msk.f32.gmra.mrb[40].mxu1 %vm692_vm2, %v661_v8 }
 0x150   :  { %v399_v11 = vadd.f32 %v2161_v10, %v2916_v25  ;;  %v393_v12 = vpop.f32.mrb[45].mxu0  ;;  %v663_v16 = vsel %vm535_vm13, %v389_v3, %v599_v7 }
 0x151   :  { %v394_v13 = vadd.f32 %v2916_v25, %v393_v12  ;;  %v662_v14 = vsel %vm534_vm14, %v384_v5, %v598_v9 }
 0x152   :  { %v601_v15 = vmul.f32 0.01, %v399_v11  ;;  %2254 = vmatprep.mubr.msk.f32.mxu1 %vm692_vm2, %v662_v14  ;;  %vm537_vm15 = vcmp.gt.f32.partialorder %v399_v11, 0.0 }
 0x153   :  { %vm536_vm0 = vcmp.gt.f32.partialorder %v394_v13, 0.0  ;;  %v600_v17 = vmul.f32 0.01, %v394_v13  ;;  %v2164_v18 = vpop.f32.mrb[46].mxu0  ;;  %2255 = vmatmul.mubr.msk.f32.gmra.mrb[42].mxu1 %vm692_vm2, %v663_v16 }
 0x154   :  { %v409_v19 = vadd.f32 %v2164_v18, %v2916_v25  ;;  %v403_v20 = vpop.f32.mrb[47].mxu0  ;;  %v665_v24 = vsel %vm537_vm15, %v399_v11, %v601_v15 }
 0x155   :  { %v404_v21 = vadd.f32 %v2916_v25, %v403_v20  ;;  %v664_v22 = vsel %vm536_vm0, %v394_v13, %v600_v17 }
 0x156   :  { %v603_v23 = vmul.f32 0.01, %v409_v19  ;;  %2257 = vmatprep.mubr.msk.f32.mxu1 %vm692_vm2, %v664_v22  ;;  %vm539_vm1 = vcmp.gt.f32.partialorder %v409_v19, 0.0 }
 0x157   :  { %vm538_vm3 = vcmp.gt.f32.partialorder %v404_v21, 0.0  ;;  %v602_v26 = vmul.f32 0.01, %v404_v21  ;;  %v2167_v27 = vpop.f32.mrb[48].mxu0  ;;  %2258 = vmatmul.mubr.msk.f32.gmra.mrb[44].mxu1 %vm692_vm2, %v665_v24 }
 0x158   :  { %v419_v28 = vadd.f32 %v2167_v27, %v2916_v25  ;;  %v413_v29 = vpop.f32.mrb[49].mxu0  ;;  %v667_v33 = vsel %vm539_vm1, %v409_v19, %v603_v23 }
 0x159   :  { %v414_v30 = vadd.f32 %v2916_v25, %v413_v29  ;;  %v666_v31 = vsel %vm538_vm3, %v404_v21, %v602_v26 }
 0x15a   :  { %v605_v32 = vmul.f32 0.01, %v419_v28  ;;  %2260 = vmatprep.mubr.msk.f32.mxu1 %vm692_vm2, %v666_v31  ;;  %vm541_vm4 = vcmp.gt.f32.partialorder %v419_v28, 0.0 }
 0x15b   :  { %vm540_vm5 = vcmp.gt.f32.partialorder %v414_v30, 0.0  ;;  %v604_v34 = vmul.f32 0.01, %v414_v30  ;;  %v2170_v35 = vpop.f32.mrb[50].mxu0  ;;  %2261 = vmatmul.mubr.msk.f32.gmra.mrb[46].mxu1 %vm692_vm2, %v667_v33 }
 0x15c   :  { %v429_v36 = vadd.f32 %v2170_v35, %v2916_v25  ;;  %v423_v37 = vpop.f32.mrb[51].mxu0  ;;  %v669_v41 = vsel %vm541_vm4, %v419_v28, %v605_v32 }
 0x15d   :  { %v424_v38 = vadd.f32 %v2916_v25, %v423_v37  ;;  %v668_v39 = vsel %vm540_vm5, %v414_v30, %v604_v34 }
 0x15e   :  { %v607_v40 = vmul.f32 0.01, %v429_v36  ;;  %2263 = vmatprep.mubr.msk.f32.mxu1 %vm692_vm2, %v668_v39  ;;  %vm543_vm6 = vcmp.gt.f32.partialorder %v429_v36, 0.0 }
 0x15f   :  { %vm542_vm7 = vcmp.gt.f32.partialorder %v424_v38, 0.0  ;;  %v606_v42 = vmul.f32 0.01, %v424_v38  ;;  %v2173_v43 = vpop.f32.mrb[52].mxu0  ;;  %2264 = vmatmul.mubr.msk.f32.gmra.mrb[48].mxu1 %vm692_vm2, %v669_v41 }
 0x160   :  { %v439_v44 = vadd.f32 %v2173_v43, %v2916_v25  ;;  %v433_v45 = vpop.f32.mrb[53].mxu0  ;;  %v671_v49 = vsel %vm543_vm6, %v429_v36, %v607_v40 }
 0x161   :  { %v434_v46 = vadd.f32 %v2916_v25, %v433_v45  ;;  %v670_v47 = vsel %vm542_vm7, %v424_v38, %v606_v42 }
 0x162   :  { %v609_v48 = vmul.f32 0.01, %v439_v44  ;;  %2266 = vmatprep.mubr.msk.f32.mxu1 %vm692_vm2, %v670_v47  ;;  %vm545_vm8 = vcmp.gt.f32.partialorder %v439_v44, 0.0 }
 0x163   :  { %vm544_vm9 = vcmp.gt.f32.partialorder %v434_v46, 0.0  ;;  %v608_v50 = vmul.f32 0.01, %v434_v46  ;;  %v2176_v51 = vpop.f32.mrb[54].mxu0  ;;  %2267 = vmatmul.mubr.msk.f32.gmra.mrb[50].mxu1 %vm692_vm2, %v671_v49 }
 0x164   :  { %v449_v52 = vadd.f32 %v2176_v51, %v2916_v25  ;;  %v443_v53 = vpop.f32.mrb[55].mxu0  ;;  %v673_v57 = vsel %vm545_vm8, %v439_v44, %v609_v48 }
 0x165   :  { %v444_v54 = vadd.f32 %v2916_v25, %v443_v53  ;;  %v672_v55 = vsel %vm544_vm9, %v434_v46, %v608_v50 }
 0x166   :  { %v611_v56 = vmul.f32 0.01, %v449_v52  ;;  %2269 = vmatprep.mubr.msk.f32.mxu1 %vm692_vm2, %v672_v55  ;;  %vm547_vm10 = vcmp.gt.f32.partialorder %v449_v52, 0.0 }
 0x167   :  { %vm546_vm11 = vcmp.gt.f32.partialorder %v444_v54, 0.0  ;;  %v610_v58 = vmul.f32 0.01, %v444_v54  ;;  %v2179_v59 = vpop.f32.mrb[56].mxu0  ;;  %2270 = vmatmul.mubr.msk.f32.gmra.mrb[52].mxu1 %vm692_vm2, %v673_v57 }
 0x168   :  { %v459_v60 = vadd.f32 %v2179_v59, %v2916_v25  ;;  %v453_v61 = vpop.f32.mrb[57].mxu0  ;;  %v675_v1 = vsel %vm547_vm10, %v449_v52, %v611_v56 }
 0x169   :  { %v454_v62 = vadd.f32 %v2916_v25, %v453_v61  ;;  %v674_v63 = vsel %vm546_vm11, %v444_v54, %v610_v58 }
 0x16a   :  { %v613_v0 = vmul.f32 0.01, %v459_v60  ;;  %2272 = vmatprep.mubr.msk.f32.mxu1 %vm692_vm2, %v674_v63  ;;  %vm549_vm12 = vcmp.gt.f32.partialorder %v459_v60, 0.0 }
 0x16b   :  { %vm548_vm13 = vcmp.gt.f32.partialorder %v454_v62, 0.0  ;;  %v612_v2 = vmul.f32 0.01, %v454_v62  ;;  %v2182_v3 = vpop.f32.mrb[58].mxu0  ;;  %2273 = vmatmul.mubr.msk.f32.gmra.mrb[54].mxu1 %vm692_vm2, %v675_v1 }
 0x16c   :  { %v469_v4 = vadd.f32 %v2182_v3, %v2916_v25  ;;  %v463_v5 = vpop.f32.mrb[59].mxu0  ;;  %v677_v9 = vsel %vm549_vm12, %v459_v60, %v613_v0 }
 0x16d   :  { %v464_v6 = vadd.f32 %v2916_v25, %v463_v5  ;;  %v676_v7 = vsel %vm548_vm13, %v454_v62, %v612_v2 }
 0x16e   :  { %v615_v8 = vmul.f32 0.01, %v469_v4  ;;  %2275 = vmatprep.mubr.msk.f32.mxu1 %vm692_vm2, %v676_v7  ;;  %vm551_vm14 = vcmp.gt.f32.partialorder %v469_v4, 0.0 }
 0x16f   :  { %vm550_vm15 = vcmp.gt.f32.partialorder %v464_v6, 0.0  ;;  %v614_v10 = vmul.f32 0.01, %v464_v6  ;;  %v2185_v11 = vpop.f32.mrb[60].mxu0  ;;  %2276 = vmatmul.mubr.msk.f32.gmra.mrb[56].mxu1 %vm692_vm2, %v677_v9 }
 0x170   :  { %v479_v12 = vadd.f32 %v2185_v11, %v2916_v25  ;;  %v473_v13 = vpop.f32.mrb[61].mxu0  ;;  %v679_v17 = vsel %vm551_vm14, %v469_v4, %v615_v8 }
 0x171   :  { %v474_v14 = vadd.f32 %v2916_v25, %v473_v13  ;;  %v678_v15 = vsel %vm550_vm15, %v464_v6, %v614_v10 }
 0x172   :  { %v617_v16 = vmul.f32 0.01, %v479_v12  ;;  %2278 = vmatprep.mubr.msk.f32.mxu1 %vm692_vm2, %v678_v15  ;;  %vm553_vm0 = vcmp.gt.f32.partialorder %v479_v12, 0.0 }
 0x173   :  { %vm552_vm1 = vcmp.gt.f32.partialorder %v474_v14, 0.0  ;;  %v616_v18 = vmul.f32 0.01, %v474_v14  ;;  %v2188_v19 = vpop.f32.mrb[62].mxu0  ;;  %2279 = vmatmul.mubr.msk.f32.gmra.mrb[58].mxu1 %vm692_vm2, %v679_v17 }
 0x174   :  { %v489_v20 = vadd.f32 %v2188_v19, %v2916_v25  ;;  %v483_v21 = vpop.f32.mrb[63].mxu0  ;;  %v681_v26 = vsel %vm553_vm0, %v479_v12, %v617_v16 }
 0x175   :  { %v484_v22 = vadd.f32 %v2916_v25, %v483_v21  ;;  %v680_v23 = vsel %vm552_vm1, %v474_v14, %v616_v18  ;;  %v3049_v25 = vld [vmem:[%s3500_s4] ss:$0 sm:$0xff] }
 0x176   :  { %v619_v24 = vmul.f32 0.01, %v489_v20  ;;  %2281 = vmatprep.mubr.msk.f32.mxu1 %vm692_vm2, %v680_v23  ;;  %vm555_vm3 = vcmp.gt.f32.partialorder %v489_v20, 0.0 }
 0x177   :  { %vm554_vm4 = vcmp.gt.f32.partialorder %v484_v22, 0.0  ;;  %v618_v27 = vmul.f32 0.01, %v484_v22  ;;  %2282 = vmatmul.mubr.msk.f32.gmra.mrb[60].mxu1 %vm692_vm2, %v681_v26  ;;  %v2575_v26 = vld [vmem:[%s3497_s0 + $0x8] sm:$0xff] }
 0x178   :  { %v683_v29 = vsel %vm555_vm3, %v489_v20, %v619_v24 }
 0x179   :  { %v682_v28 = vsel %vm554_vm4, %v484_v22, %v618_v27 }
 0x17a   :  { %2284 = vmatprep.mubr.msk.f32.mxu1 %vm692_vm2, %v682_v28 }
 0x17b   :  { %2285 = vmatmul.mubr.msk.f32.gmra.mrb[62].mxu1 %vm692_vm2, %v683_v29 }
 0x1d2   :  { %v2193_v30 = vpop.f32.mrb[0].mxu1 }
 0x1d3   :  { %v957_v31 = vadd.f32 %v2193_v30, %v3049_v25  ;;  %v951_v32 = vpop.f32.mrb[1].mxu1 }
 0x1d4   :  { %v952_v33 = vadd.f32 %v3049_v25, %v951_v32 }
 0x1d5   :  { %v1853_v34 = vmul.f32 -1.442695, %v957_v31  ;;  %v2576_v31 = vld [vmem:[%s3497_s0] sm:$0xff] }
 0x1d6   :  { %v1852_v35 = vmul.f32 -1.442695, %v952_v33  ;;  %v2196_v36 = vpop.f32.mrb[2].mxu1 }
 0x1d7   :  { %2319 = vpow2.f32 %v1853_v34  ;;  %v967_v37 = vadd.f32 %v2196_v36, %v3049_v25  ;;  %v961_v38 = vpop.f32.mrb[3].mxu1 }
 0x1d8   :  { %2321 = vpow2.f32 %v1852_v35  ;;  %v962_v39 = vadd.f32 %v3049_v25, %v961_v38 }
 0x1d9   :  { %v1855_v40 = vmul.f32 -1.442695, %v967_v37 }
 0x1da   :  { %v1854_v41 = vmul.f32 -1.442695, %v962_v39  ;;  %v2199_v42 = vpop.f32.mrb[4].mxu1 }
 0x1db   :  { %2323 = vpow2.f32 %v1855_v40  ;;  %v977_v43 = vadd.f32 %v2199_v42, %v3049_v25  ;;  %v971_v44 = vpop.f32.mrb[5].mxu1  ;;  %v2577_v42 = vld [vmem:[%s3497_s0 + $0x18] sm:$0xff] }
 0x1dc   :  { %2325 = vpow2.f32 %v1854_v41  ;;  %v972_v45 = vadd.f32 %v3049_v25, %v971_v44 }
 0x1dd   :  { %v1857_v46 = vmul.f32 -1.442695, %v977_v43 }
 0x1de   :  { %v1856_v47 = vmul.f32 -1.442695, %v972_v45  ;;  %v2202_v48 = vpop.f32.mrb[6].mxu1 }
 0x1df   :  { %2327 = vpow2.f32 %v1857_v46  ;;  %v987_v49 = vadd.f32 %v2202_v48, %v3049_v25  ;;  %v981_v50 = vpop.f32.mrb[7].mxu1 }
 0x1e0   :  { %2329 = vpow2.f32 %v1856_v47  ;;  %v982_v51 = vadd.f32 %v3049_v25, %v981_v50  ;;  %v2578_v47 = vld [vmem:[%s3497_s0 + $0x10] sm:$0xff] }
 0x1e1   :  { %v2320_v52 = vpop.eup %2319  ;;  %v1859_v53 = vmul.f32 -1.442695, %v987_v49 }
 0x1e2   :  { %v2322_v54 = vpop.eup %2321  ;;  %v1463_v55 = vadd.f32 1.0, %v2320_v52  ;;  %v1858_v56 = vmul.f32 -1.442695, %v982_v51  ;;  %v2205_v57 = vpop.f32.mrb[8].mxu1 }
 0x1e3   :  { %v1462_v58 = vadd.f32 1.0, %v2322_v54  ;;  %2331 = vpow2.f32 %v1859_v53  ;;  %v997_v59 = vadd.f32 %v2205_v57, %v3049_v25  ;;  %v991_v60 = vpop.f32.mrb[9].mxu1 }
 0x1e4   :  { %2333 = vrcp.f32 %v1463_v55  ;;  %v992_v61 = vadd.f32 %v3049_v25, %v991_v60 }
 0x1e5   :  { %v2324_v62 = vpop.eup %2323  ;;  %2335 = vrcp.f32 %v1462_v58  ;;  %v1861_v63 = vmul.f32 -1.442695, %v997_v59  ;;  %v2579_v58 = vld [vmem:[%s3497_s0 + $0x28] sm:$0xff] }
 0x1e6   :  { %v2326_v0 = vpop.eup %2325  ;;  %v1465_v1 = vadd.f32 1.0, %v2324_v62  ;;  %2337 = vpow2.f32 %v1858_v56  ;;  %v1860_v2 = vmul.f32 -1.442695, %v992_v61  ;;  %v2208_v3 = vpop.f32.mrb[10].mxu1 }
 0x1e7   :  { %v1464_v4 = vadd.f32 1.0, %v2326_v0  ;;  %2339 = vpow2.f32 %v1861_v63  ;;  %v1007_v5 = vadd.f32 %v2208_v3, %v3049_v25  ;;  %v1001_v6 = vpop.f32.mrb[11].mxu1  ;;  %v2580_v63 = vld [vmem:[%s3497_s0 + $0x20] sm:$0xff] }
 0x1e8   :  { %2341 = vrcp.f32 %v1465_v1  ;;  %v1002_v7 = vadd.f32 %v3049_v25, %v1001_v6 }
 0x1e9   :  { %v2328_v8 = vpop.eup %2327  ;;  %2343 = vrcp.f32 %v1464_v4  ;;  %v1863_v9 = vmul.f32 -1.442695, %v1007_v5 }
 0x1ea   :  { %v2330_v10 = vpop.eup %2329  ;;  %v1467_v11 = vadd.f32 1.0, %v2328_v8  ;;  %2345 = vpow2.f32 %v1860_v2  ;;  %v1862_v12 = vmul.f32 -1.442695, %v1002_v7  ;;  %v2211_v13 = vpop.f32.mrb[12].mxu1 }
 0x1eb   :  { %v1466_v14 = vadd.f32 1.0, %v2330_v10  ;;  %2347 = vpow2.f32 %v1863_v9  ;;  %v1017_v15 = vadd.f32 %v2211_v13, %v3049_v25  ;;  %v1011_v16 = vpop.f32.mrb[13].mxu1  ;;  %v2581_v9 = vld [vmem:[%s3497_s0 + $0x38] sm:$0xff] }
 0x1ec   :  { %2349 = vrcp.f32 %v1467_v11  ;;  %v1012_v17 = vadd.f32 %v3049_v25, %v1011_v16 }
 0x1ed   :  { %v2332_v18 = vpop.eup %2331  ;;  %2351 = vrcp.f32 %v1466_v14  ;;  %v1865_v19 = vmul.f32 -1.442695, %v1017_v15 }
 0x1ee   :  { %v2334_v20 = vpop.eup %2333  ;;  %v1469_v21 = vadd.f32 1.0, %v2332_v18  ;;  %2353 = vpow2.f32 %v1862_v12  ;;  %v1864_v22 = vmul.f32 -1.442695, %v1012_v17  ;;  %v2214_v23 = vpop.f32.mrb[14].mxu1 }
 0x1ef   :  { %v2336_v24 = vpop.eup %2335  ;;  %v1655_v27 = vmul.f32 %v2575_v26, %v2334_v20  ;;  %2355 = vpow2.f32 %v1865_v19  ;;  %v1027_v28 = vadd.f32 %v2214_v23, %v3049_v25  ;;  %v1021_v29 = vpop.f32.mrb[15].mxu1  ;;  %v2582_v19 = vld [vmem:[%s3497_s0 + $0x30] sm:$0xff] }
 0x1f0   :  { %v2338_v30 = vpop.eup %2337  ;;  %v1654_v32 = vmul.f32 %v2576_v31, %v2336_v24  ;;  %2357 = vrcp.f32 %v1469_v21  ;;  %v1022_v33 = vadd.f32 %v3049_v25, %v1021_v29  ;;  %v2583_v24 = vld [vmem:[%s3497_s0 + $0x48] sm:$0xff] }
 0x1f1   :  { %v2340_v34 = vpop.eup %2339  ;;  %1719 = vst [vmem:[%s3501_s5 + $0x8] sm:$0xff] %v1655_v27  ;;  %v1468_v35 = vadd.f32 1.0, %v2338_v30  ;;  %2359 = vpow2.f32 %v1864_v22  ;;  %v1867_v36 = vmul.f32 -1.442695, %v1027_v28 }
 0x1f2   :  { %v2342_v37 = vpop.eup %2341  ;;  %1718 = vst [vmem:[%s3501_s5] sm:$0xff] %v1654_v32  ;;  %v1471_v38 = vadd.f32 1.0, %v2340_v34  ;;  %v1866_v39 = vmul.f32 -1.442695, %v1022_v33  ;;  %v2217_v40 = vpop.f32.mrb[16].mxu1 }
 0x1f3   :  { %v2344_v41 = vpop.eup %2343  ;;  %v1657_v43 = vmul.f32 %v2577_v42, %v2342_v37  ;;  %2361 = vrcp.f32 %v1468_v35  ;;  %v1037_v44 = vadd.f32 %v2217_v40, %v3049_v25  ;;  %v1031_v45 = vpop.f32.mrb[17].mxu1 }
 0x1f4   :  { %v2346_v46 = vpop.eup %2345  ;;  %v1656_v48 = vmul.f32 %v2578_v47, %v2344_v41  ;;  %2363 = vrcp.f32 %v1471_v38  ;;  %v1032_v49 = vadd.f32 %v3049_v25, %v1031_v45  ;;  %v2585_v41 = vld [vmem:[%s3497_s0 + $0x58] sm:$0xff] }
 0x1f5   :  { %v2348_v50 = vpop.eup %2347  ;;  %1721 = vst [vmem:[%s3501_s5 + $0x18] sm:$0xff] %v1657_v43  ;;  %v1470_v51 = vadd.f32 1.0, %v2346_v46  ;;  %2365 = vpow2.f32 %v1867_v36  ;;  %v1869_v52 = vmul.f32 -1.442695, %v1037_v44  ;;  %v2584_v36 = vld [vmem:[%s3497_s0 + $0x40] sm:$0xff] }
 0x1f6   :  { %v2350_v53 = vpop.eup %2349  ;;  %1720 = vst [vmem:[%s3501_s5 + $0x10] sm:$0xff] %v1656_v48  ;;  %v1473_v54 = vadd.f32 1.0, %v2348_v50  ;;  %2367 = vpow2.f32 %v1866_v39  ;;  %v1868_v55 = vmul.f32 -1.442695, %v1032_v49  ;;  %v2220_v56 = vpop.f32.mrb[18].mxu1 }
 0x1f7   :  { %v2352_v57 = vpop.eup %2351  ;;  %v1659_v59 = vmul.f32 %v2579_v58, %v2350_v53  ;;  %2369 = vrcp.f32 %v1470_v51  ;;  %v1047_v60 = vadd.f32 %v2220_v56, %v3049_v25  ;;  %v1041_v61 = vpop.f32.mrb[19].mxu1 }
 0x1f8   :  { %v2354_v62 = vpop.eup %2353  ;;  %v1658_v0 = vmul.f32 %v2580_v63, %v2352_v57  ;;  %2371 = vrcp.f32 %v1473_v54  ;;  %v1042_v1 = vadd.f32 %v3049_v25, %v1041_v61  ;;  %v2587_v57 = vld [vmem:[%s3497_s0 + $0x68] sm:$0xff] }
 0x1f9   :  { %v2356_v2 = vpop.eup %2355  ;;  %1723 = vst [vmem:[%s3501_s5 + $0x28] sm:$0xff] %v1659_v59  ;;  %v1472_v3 = vadd.f32 1.0, %v2354_v62  ;;  %2373 = vpow2.f32 %v1869_v52  ;;  %v1871_v4 = vmul.f32 -1.442695, %v1047_v60  ;;  %v2586_v52 = vld [vmem:[%s3497_s0 + $0x50] sm:$0xff] }
 0x1fa   :  { %v2358_v5 = vpop.eup %2357  ;;  %1722 = vst [vmem:[%s3501_s5 + $0x20] sm:$0xff] %v1658_v0  ;;  %v1475_v6 = vadd.f32 1.0, %v2356_v2  ;;  %2375 = vpow2.f32 %v1868_v55  ;;  %v2223_v7 = vpop.f32.mrb[20].mxu1  ;;  %v1870_v11 = vmul.f32 -1.442695, %v1042_v1  ;;  %v2588_v1 = vld [vmem:[%s3497_s0 + $0x60] sm:$0xff] }
 0x1fb   :  { %v2360_v8 = vpop.eup %2359  ;;  %v1661_v10 = vmul.f32 %v2581_v9, %v2358_v5  ;;  %2377 = vrcp.f32 %v1472_v3  ;;  %v1057_v12 = vadd.f32 %v2223_v7, %v3049_v25  ;;  %v1051_v13 = vpop.f32.mrb[21].mxu1 }
 0x1fc   :  { %2379 = vrcp.f32 %v1475_v6  ;;  %v1474_v14 = vadd.f32 1.0, %v2360_v8  ;;  %v1052_v15 = vadd.f32 %v3049_v25, %v1051_v13 }
 0x1fd   :  { %v2362_v16 = vpop.eup %2361  ;;  %1725 = vst [vmem:[%s3501_s5 + $0x38] sm:$0xff] %v1661_v10  ;;  %2381 = vpow2.f32 %v1871_v4  ;;  %v1873_v17 = vmul.f32 -1.442695, %v1057_v12 }
 0x1fe   :  { %v2364_v18 = vpop.eup %2363  ;;  %v1660_v20 = vmul.f32 %v2582_v19, %v2362_v16  ;;  %2383 = vrcp.f32 %v1474_v14  ;;  %v1872_v21 = vmul.f32 -1.442695, %v1052_v15  ;;  %v2226_v22 = vpop.f32.mrb[22].mxu1  ;;  %v2589_v16 = vld [vmem:[%s3497_s0 + $0x78] sm:$0xff] }
 0x1ff   :  { %v2366_v23 = vpop.eup %2365  ;;  %v1663_v26 = vmul.f32 %v2583_v24, %v2364_v18  ;;  %2385 = vpow2.f32 %v1870_v11  ;;  %v1067_v27 = vadd.f32 %v2226_v22, %v3049_v25  ;;  %v1061_v28 = vpop.f32.mrb[23].mxu1 }
 0x200   :  { %v2368_v29 = vpop.eup %2367  ;;  %1724 = vst [vmem:[%s3501_s5 + $0x30] sm:$0xff] %v1660_v20  ;;  %v1477_v30 = vadd.f32 1.0, %v2366_v23  ;;  %2387 = vpow2.f32 %v1873_v17  ;;  %v1062_v31 = vadd.f32 %v3049_v25, %v1061_v28  ;;  %v2590_v20 = vld [vmem:[%s3497_s0 + $0x70] sm:$0xff] }
 0x201   :  { %v2370_v32 = vpop.eup %2369  ;;  %1727 = vst [vmem:[%s3501_s5 + $0x48] sm:$0xff] %v1663_v26  ;;  %v1476_v33 = vadd.f32 1.0, %v2368_v29  ;;  %2389 = vpow2.f32 %v1872_v21  ;;  %v1875_v34 = vmul.f32 -1.442695, %v1067_v27 }
 0x202   :  { %v2372_v35 = vpop.eup %2371  ;;  %v1662_v37 = vmul.f32 %v2584_v36, %v2370_v32  ;;  %2391 = vrcp.f32 %v1477_v30  ;;  %v1874_v38 = vmul.f32 -1.442695, %v1062_v31  ;;  %v2229_v39 = vpop.f32.mrb[24].mxu1 }
 0x203   :  { %v2374_v40 = vpop.eup %2373  ;;  %v1665_v42 = vmul.f32 %v2585_v41, %v2372_v35  ;;  %2393 = vrcp.f32 %v1476_v33  ;;  %v1077_v43 = vadd.f32 %v2229_v39, %v3049_v25  ;;  %v1071_v44 = vpop.f32.mrb[25].mxu1  ;;  %v2591_v33 = vld [vmem:[%s3497_s0 + $0x88] sm:$0xff] }
 0x204   :  { %v2376_v45 = vpop.eup %2375  ;;  %1726 = vst [vmem:[%s3501_s5 + $0x40] sm:$0xff] %v1662_v37  ;;  %v1479_v46 = vadd.f32 1.0, %v2374_v40  ;;  %2395 = vpow2.f32 %v1875_v34  ;;  %v1072_v47 = vadd.f32 %v3049_v25, %v1071_v44  ;;  %v2592_v37 = vld [vmem:[%s3497_s0 + $0x80] sm:$0xff] }
 0x205   :  { %v2378_v48 = vpop.eup %2377  ;;  %1729 = vst [vmem:[%s3501_s5 + $0x58] sm:$0xff] %v1665_v42  ;;  %v1478_v49 = vadd.f32 1.0, %v2376_v45  ;;  %2397 = vpow2.f32 %v1874_v38  ;;  %v1877_v50 = vmul.f32 -1.442695, %v1077_v43 }
 0x206   :  { %v2380_v51 = vpop.eup %2379  ;;  %v1664_v53 = vmul.f32 %v2586_v52, %v2378_v48  ;;  %2399 = vrcp.f32 %v1479_v46  ;;  %v1876_v54 = vmul.f32 -1.442695, %v1072_v47  ;;  %v2232_v55 = vpop.f32.mrb[26].mxu1 }
 0x207   :  { %v2382_v56 = vpop.eup %2381  ;;  %v1667_v58 = vmul.f32 %v2587_v57, %v2380_v51  ;;  %2401 = vrcp.f32 %v1478_v49  ;;  %v1087_v59 = vadd.f32 %v2232_v55, %v3049_v25  ;;  %v1081_v60 = vpop.f32.mrb[27].mxu1  ;;  %v2593_v49 = vld [vmem:[%s3497_s0 + $0x98] sm:$0xff]  ;;  %v2594_v57 = vld [vmem:[%s3497_s0 + $0x90] sm:$0xff] }
 0x208   :  { %v2384_v61 = vpop.eup %2383  ;;  %1728 = vst [vmem:[%s3501_s5 + $0x50] sm:$0xff] %v1664_v53  ;;  %v1481_v62 = vadd.f32 1.0, %v2382_v56  ;;  %2403 = vpow2.f32 %v1877_v50  ;;  %v1082_v63 = vadd.f32 %v3049_v25, %v1081_v60 }
 0x209   :  { %v2386_v0 = vpop.eup %2385  ;;  %1731 = vst [vmem:[%s3501_s5 + $0x68] sm:$0xff] %v1667_v58  ;;  %v1666_v2 = vmul.f32 %v2588_v1, %v2384_v61  ;;  %2405 = vpow2.f32 %v1876_v54  ;;  %v1879_v3 = vmul.f32 -1.442695, %v1087_v59 }
 0x20a   :  { %v2388_v4 = vpop.eup %2387  ;;  %2407 = vrcp.f32 %v1481_v62  ;;  %v1480_v5 = vadd.f32 1.0, %v2386_v0  ;;  %v2235_v6 = vpop.f32.mrb[28].mxu1  ;;  %v1878_v9 = vmul.f32 -1.442695, %v1082_v63  ;;  %v2595_v62 = vld [vmem:[%s3497_s0 + $0xa8] sm:$0xff] }
 0x20b   :  { %v2390_v7 = vpop.eup %2389  ;;  %1730 = vst [vmem:[%s3501_s5 + $0x60] sm:$0xff] %v1666_v2  ;;  %v1483_v8 = vadd.f32 1.0, %v2388_v4  ;;  %2409 = vpow2.f32 %v1879_v3  ;;  %v1097_v10 = vadd.f32 %v2235_v6, %v3049_v25  ;;  %v1091_v11 = vpop.f32.mrb[29].mxu1  ;;  %v2596_v2 = vld [vmem:[%s3497_s0 + $0xa0] sm:$0xff] }
 0x20c   :  { %v2392_v12 = vpop.eup %2391  ;;  %2411 = vrcp.f32 %v1480_v5  ;;  %v1482_v13 = vadd.f32 1.0, %v2390_v7  ;;  %v1092_v14 = vadd.f32 %v3049_v25, %v1091_v11 }
 0x20d   :  { %v2394_v15 = vpop.eup %2393  ;;  %v1669_v17 = vmul.f32 %v2589_v16, %v2392_v12  ;;  %2413 = vrcp.f32 %v1483_v8  ;;  %v1881_v18 = vmul.f32 -1.442695, %v1097_v10 }
 0x20e   :  { %v2396_v19 = vpop.eup %2395  ;;  %v1668_v21 = vmul.f32 %v2590_v20, %v2394_v15  ;;  %2415 = vrcp.f32 %v1482_v13  ;;  %v2238_v22 = vpop.f32.mrb[30].mxu1  ;;  %v1880_v26 = vmul.f32 -1.442695, %v1092_v14  ;;  %v2597_v14 = vld [vmem:[%s3497_s0 + $0xb8] sm:$0xff] }
 0x20f   :  { %v2398_v23 = vpop.eup %2397  ;;  %1733 = vst [vmem:[%s3501_s5 + $0x78] sm:$0xff] %v1669_v17  ;;  %v1485_v24 = vadd.f32 1.0, %v2396_v19  ;;  %2417 = vpow2.f32 %v1878_v9  ;;  %v1107_v27 = vadd.f32 %v2238_v22, %v3049_v25  ;;  %v1101_v28 = vpop.f32.mrb[31].mxu1 }
 0x210   :  { %v2400_v29 = vpop.eup %2399  ;;  %1732 = vst [vmem:[%s3501_s5 + $0x70] sm:$0xff] %v1668_v21  ;;  %v1484_v30 = vadd.f32 1.0, %v2398_v23  ;;  %2419 = vpow2.f32 %v1881_v18  ;;  %v1102_v31 = vadd.f32 %v3049_v25, %v1101_v28  ;;  %v2598_v18 = vld [vmem:[%s3497_s0 + $0xb0] sm:$0xff] }
 0x211   :  { %v2402_v32 = vpop.eup %2401  ;;  %v1671_v34 = vmul.f32 %v2591_v33, %v2400_v29  ;;  %2421 = vrcp.f32 %v1485_v24  ;;  %v1883_v35 = vmul.f32 -1.442695, %v1107_v27 }
 0x212   :  { %v2404_v36 = vpop.eup %2403  ;;  %v1670_v38 = vmul.f32 %v2592_v37, %v2402_v32  ;;  %2423 = vrcp.f32 %v1484_v30  ;;  %v2241_v39 = vpop.f32.mrb[32].mxu1  ;;  %v1882_v42 = vmul.f32 -1.442695, %v1102_v31  ;;  %v2599_v31 = vld [vmem:[%s3497_s0 + $0xc8] sm:$0xff] }
 0x213   :  { %v2406_v40 = vpop.eup %2405  ;;  %1735 = vst [vmem:[%s3501_s5 + $0x88] sm:$0xff] %v1671_v34  ;;  %v1487_v41 = vadd.f32 1.0, %v2404_v36  ;;  %2425 = vpow2.f32 %v1880_v26  ;;  %v1117_v43 = vadd.f32 %v2241_v39, %v3049_v25  ;;  %v1111_v44 = vpop.f32.mrb[33].mxu1 }
 0x214   :  { %v2408_v45 = vpop.eup %2407  ;;  %1734 = vst [vmem:[%s3501_s5 + $0x80] sm:$0xff] %v1670_v38  ;;  %v1486_v46 = vadd.f32 1.0, %v2406_v40  ;;  %2427 = vpow2.f32 %v1883_v35  ;;  %v1112_v47 = vadd.f32 %v3049_v25, %v1111_v44  ;;  %v2600_v35 = vld [vmem:[%s3497_s0 + $0xc0] sm:$0xff] }
 0x215   :  { %v2410_v48 = vpop.eup %2409  ;;  %v1673_v50 = vmul.f32 %v2593_v49, %v2408_v45  ;;  %2429 = vrcp.f32 %v1487_v41  ;;  %v1885_v51 = vmul.f32 -1.442695, %v1117_v43  ;;  %v2601_v43 = vld [vmem:[%s3497_s0 + $0xd8] sm:$0xff] }
 0x216   :  { %v2412_v52 = vpop.eup %2411  ;;  %2431 = vrcp.f32 %v1486_v46  ;;  %v1489_v53 = vadd.f32 1.0, %v2410_v48  ;;  %v1884_v54 = vmul.f32 -1.442695, %v1112_v47  ;;  %v2244_v55 = vpop.f32.mrb[34].mxu1 }
 0x217   :  { %v2414_v56 = vpop.eup %2413  ;;  %1737 = vst [vmem:[%s3501_s5 + $0x98] sm:$0xff] %v1673_v50  ;;  %v1672_v58 = vmul.f32 %v2594_v57, %v2412_v52  ;;  %2433 = vpow2.f32 %v1882_v42  ;;  %v1127_v59 = vadd.f32 %v2244_v55, %v3049_v25  ;;  %v1121_v60 = vpop.f32.mrb[35].mxu1 }
 0x218   :  { %v2416_v61 = vpop.eup %2415  ;;  %v1675_v63 = vmul.f32 %v2595_v62, %v2414_v56  ;;  %2435 = vrcp.f32 %v1489_v53  ;;  %v1122_v0 = vadd.f32 %v3049_v25, %v1121_v60 }
 0x219   :  { %v2418_v1 = vpop.eup %2417  ;;  %1736 = vst [vmem:[%s3501_s5 + $0x90] sm:$0xff] %v1672_v58  ;;  %v1674_v3 = vmul.f32 %v2596_v2, %v2416_v61  ;;  %2437 = vpow2.f32 %v1885_v51  ;;  %v1887_v4 = vmul.f32 -1.442695, %v1127_v59  ;;  %v2602_v58 = vld [vmem:[%s3497_s0 + $0xd0] sm:$0xff] }
 0x21a   :  { %v2420_v5 = vpop.eup %2419  ;;  %1739 = vst [vmem:[%s3501_s5 + $0xa8] sm:$0xff] %v1675_v63  ;;  %v1488_v6 = vadd.f32 1.0, %v2418_v1  ;;  %2439 = vpow2.f32 %v1884_v54  ;;  %v1886_v7 = vmul.f32 -1.442695, %v1122_v0  ;;  %v2247_v8 = vpop.f32.mrb[36].mxu1  ;;  %v2603_v63 = vld [vmem:[%s3497_s0 + $0xe8] sm:$0xff] }
 0x21b   :  { %v2422_v9 = vpop.eup %2421  ;;  %1738 = vst [vmem:[%s3501_s5 + $0xa0] sm:$0xff] %v1674_v3  ;;  %v1491_v10 = vadd.f32 1.0, %v2420_v5  ;;  %2441 = vpow2.f32 %v1887_v4  ;;  %v1137_v11 = vadd.f32 %v2247_v8, %v3049_v25  ;;  %v1131_v12 = vpop.f32.mrb[37].mxu1 }
 0x21c   :  { %v2424_v13 = vpop.eup %2423  ;;  %v1677_v15 = vmul.f32 %v2597_v14, %v2422_v9  ;;  %2443 = vrcp.f32 %v1488_v6  ;;  %v1132_v16 = vadd.f32 %v3049_v25, %v1131_v12 }
 0x21d   :  { %v2426_v17 = vpop.eup %2425  ;;  %v1676_v19 = vmul.f32 %v2598_v18, %v2424_v13  ;;  %2445 = vrcp.f32 %v1491_v10  ;;  %v1889_v20 = vmul.f32 -1.442695, %v1137_v11  ;;  %v2604_v10 = vld [vmem:[%s3497_s0 + $0xe0] sm:$0xff] }
 0x21e   :  { %v2428_v21 = vpop.eup %2427  ;;  %1741 = vst [vmem:[%s3501_s5 + $0xb8] sm:$0xff] %v1677_v15  ;;  %v1490_v22 = vadd.f32 1.0, %v2426_v17  ;;  %2447 = vpow2.f32 %v1886_v7  ;;  %v1888_v23 = vmul.f32 -1.442695, %v1132_v16  ;;  %v2250_v24 = vpop.f32.mrb[38].mxu1  ;;  %v2605_v15 = vld [vmem:[%s3497_s0 + $0xf8] sm:$0xff] }
 0x21f   :  { %v2430_v26 = vpop.eup %2429  ;;  %1740 = vst [vmem:[%s3501_s5 + $0xb0] sm:$0xff] %v1676_v19  ;;  %v1493_v27 = vadd.f32 1.0, %v2428_v21  ;;  %2449 = vpow2.f32 %v1889_v20  ;;  %v1147_v28 = vadd.f32 %v2250_v24, %v3049_v25  ;;  %v1141_v29 = vpop.f32.mrb[39].mxu1 }
 0x220   :  { %v2432_v30 = vpop.eup %2431  ;;  %v1679_v32 = vmul.f32 %v2599_v31, %v2430_v26  ;;  %2451 = vrcp.f32 %v1490_v22  ;;  %v1142_v33 = vadd.f32 %v3049_v25, %v1141_v29  ;;  %v2606_v26 = vld [vmem:[%s3497_s0 + $0xf0] sm:$0xff] }
 0x221   :  { %v2434_v34 = vpop.eup %2433  ;;  %v1678_v36 = vmul.f32 %v2600_v35, %v2432_v30  ;;  %2453 = vrcp.f32 %v1493_v27  ;;  %v1891_v37 = vmul.f32 -1.442695, %v1147_v28  ;;  %v2607_v35 = vld [vmem:[%s3497_s0 + $0x108] sm:$0xff] }
 0x222   :  { %v2436_v38 = vpop.eup %2435  ;;  %1743 = vst [vmem:[%s3501_s5 + $0xc8] sm:$0xff] %v1679_v32  ;;  %v1492_v39 = vadd.f32 1.0, %v2434_v34  ;;  %2455 = vpow2.f32 %v1888_v23  ;;  %v1890_v40 = vmul.f32 -1.442695, %v1142_v33  ;;  %v2253_v41 = vpop.f32.mrb[40].mxu1 }
 0x223   :  { %v2438_v42 = vpop.eup %2437  ;;  %1742 = vst [vmem:[%s3501_s5 + $0xc0] sm:$0xff] %v1678_v36  ;;  %v1681_v44 = vmul.f32 %v2601_v43, %v2436_v38  ;;  %2457 = vpow2.f32 %v1891_v37  ;;  %v1157_v45 = vadd.f32 %v2253_v41, %v3049_v25  ;;  %v1151_v46 = vpop.f32.mrb[41].mxu1 }
 0x224   :  { %v2440_v47 = vpop.eup %2439  ;;  %2459 = vrcp.f32 %v1492_v39  ;;  %v1495_v48 = vadd.f32 1.0, %v2438_v42  ;;  %v1152_v49 = vadd.f32 %v3049_v25, %v1151_v46  ;;  %v2608_v39 = vld [vmem:[%s3497_s0 + $0x100] sm:$0xff] }
 0x225   :  { %v2442_v50 = vpop.eup %2441  ;;  %1745 = vst [vmem:[%s3501_s5 + $0xd8] sm:$0xff] %v1681_v44  ;;  %v1494_v51 = vadd.f32 1.0, %v2440_v47  ;;  %2461 = vpow2.f32 %v1890_v40  ;;  %v1893_v52 = vmul.f32 -1.442695, %v1157_v45  ;;  %v2609_v44 = vld [vmem:[%s3497_s0 + $0x118] sm:$0xff] }
 0x226   :  { %v2444_v53 = vpop.eup %2443  ;;  %2463 = vrcp.f32 %v1495_v48  ;;  %v1497_v54 = vadd.f32 1.0, %v2442_v50  ;;  %v1892_v55 = vmul.f32 -1.442695, %v1152_v49  ;;  %v2256_v56 = vpop.f32.mrb[42].mxu1 }
 0x227   :  { %v2446_v57 = vpop.eup %2445  ;;  %v1680_v59 = vmul.f32 %v2602_v58, %v2444_v53  ;;  %2465 = vrcp.f32 %v1494_v51  ;;  %v1167_v60 = vadd.f32 %v2256_v56, %v3049_v25  ;;  %v1161_v61 = vpop.f32.mrb[43].mxu1 }
 0x228   :  { %v2448_v62 = vpop.eup %2447  ;;  %v1683_v0 = vmul.f32 %v2603_v63, %v2446_v57  ;;  %2467 = vrcp.f32 %v1497_v54  ;;  %v1162_v1 = vadd.f32 %v3049_v25, %v1161_v61 }
 0x229   :  { %v2450_v2 = vpop.eup %2449  ;;  %1744 = vst [vmem:[%s3501_s5 + $0xd0] sm:$0xff] %v1680_v59  ;;  %v1496_v3 = vadd.f32 1.0, %v2448_v62  ;;  %2469 = vpow2.f32 %v1893_v52  ;;  %v1895_v4 = vmul.f32 -1.442695, %v1167_v60  ;;  %v2611_v60 = vld [vmem:[%s3497_s0 + $0x128] sm:$0xff] }
 0x22a   :  { %v2452_v5 = vpop.eup %2451  ;;  %1747 = vst [vmem:[%s3501_s5 + $0xe8] sm:$0xff] %v1683_v0  ;;  %v1499_v6 = vadd.f32 1.0, %v2450_v2  ;;  %2471 = vpow2.f32 %v1892_v55  ;;  %v1894_v7 = vmul.f32 -1.442695, %v1162_v1  ;;  %v2259_v8 = vpop.f32.mrb[44].mxu1  ;;  %v2610_v55 = vld [vmem:[%s3497_s0 + $0x110] sm:$0xff] }
 0x22b   :  { %v2454_v9 = vpop.eup %2453  ;;  %v1682_v11 = vmul.f32 %v2604_v10, %v2452_v5  ;;  %2473 = vrcp.f32 %v1496_v3  ;;  %v1177_v12 = vadd.f32 %v2259_v8, %v3049_v25  ;;  %v1171_v13 = vpop.f32.mrb[45].mxu1 }
 0x22c   :  { %v2456_v14 = vpop.eup %2455  ;;  %v1685_v16 = vmul.f32 %v2605_v15, %v2454_v9  ;;  %2475 = vrcp.f32 %v1499_v6  ;;  %v1172_v17 = vadd.f32 %v3049_v25, %v1171_v13 }
 0x22d   :  { %v2458_v18 = vpop.eup %2457  ;;  %1746 = vst [vmem:[%s3501_s5 + $0xe0] sm:$0xff] %v1682_v11  ;;  %v1498_v19 = vadd.f32 1.0, %v2456_v14  ;;  %2477 = vpow2.f32 %v1895_v4  ;;  %v1897_v20 = vmul.f32 -1.442695, %v1177_v12  ;;  %v2613_v12 = vld [vmem:[%s3497_s0 + $0x138] sm:$0xff] }
 0x22e   :  { %v2460_v21 = vpop.eup %2459  ;;  %1749 = vst [vmem:[%s3501_s5 + $0xf8] sm:$0xff] %v1685_v16  ;;  %v1501_v22 = vadd.f32 1.0, %v2458_v18  ;;  %2479 = vpow2.f32 %v1894_v7  ;;  %v2262_v23 = vpop.f32.mrb[46].mxu1  ;;  %v1896_v28 = vmul.f32 -1.442695, %v1172_v17  ;;  %v2612_v7 = vld [vmem:[%s3497_s0 + $0x120] sm:$0xff] }
 0x22f   :  { %v2462_v24 = vpop.eup %2461  ;;  %v1684_v27 = vmul.f32 %v2606_v26, %v2460_v21  ;;  %2481 = vrcp.f32 %v1498_v19  ;;  %v1187_v29 = vadd.f32 %v2262_v23, %v3049_v25  ;;  %v1181_v30 = vpop.f32.mrb[47].mxu1 }
 0x230   :  { %v2464_v31 = vpop.eup %2463  ;;  %2483 = vrcp.f32 %v1501_v22  ;;  %v1500_v32 = vadd.f32 1.0, %v2462_v24  ;;  %v1182_v33 = vadd.f32 %v3049_v25, %v1181_v30 }
 0x231   :  { %v2466_v34 = vpop.eup %2465  ;;  %1748 = vst [vmem:[%s3501_s5 + $0xf0] sm:$0xff] %v1684_v27  ;;  %v1687_v36 = vmul.f32 %v2607_v35, %v2464_v31  ;;  %2485 = vpow2.f32 %v1897_v20  ;;  %v1899_v37 = vmul.f32 -1.442695, %v1187_v29  ;;  %v2614_v20 = vld [vmem:[%s3497_s0 + $0x130] sm:$0xff] }
 0x232   :  { %v2468_v38 = vpop.eup %2467  ;;  %v1686_v40 = vmul.f32 %v2608_v39, %v2466_v34  ;;  %2487 = vrcp.f32 %v1500_v32  ;;  %v1898_v41 = vmul.f32 -1.442695, %v1182_v33  ;;  %v2265_v42 = vpop.f32.mrb[48].mxu1 }
 0x233   :  { %v2470_v43 = vpop.eup %2469  ;;  %1751 = vst [vmem:[%s3501_s5 + $0x108] sm:$0xff] %v1687_v36  ;;  %v1689_v45 = vmul.f32 %v2609_v44, %v2468_v38  ;;  %2489 = vpow2.f32 %v1896_v28  ;;  %v1197_v46 = vadd.f32 %v2265_v42, %v3049_v25  ;;  %v1191_v47 = vpop.f32.mrb[49].mxu1  ;;  %v2615_v36 = vld [vmem:[%s3497_s0 + $0x148] sm:$0xff] }
 0x234   :  { %v2472_v48 = vpop.eup %2471  ;;  %1750 = vst [vmem:[%s3501_s5 + $0x100] sm:$0xff] %v1686_v40  ;;  %v1503_v49 = vadd.f32 1.0, %v2470_v43  ;;  %2491 = vpow2.f32 %v1899_v37  ;;  %v1192_v50 = vadd.f32 %v3049_v25, %v1191_v47  ;;  %v2616_v40 = vld [vmem:[%s3497_s0 + $0x140] sm:$0xff] }
 0x235   :  { %v2474_v51 = vpop.eup %2473  ;;  %1753 = vst [vmem:[%s3501_s5 + $0x118] sm:$0xff] %v1689_v45  ;;  %v1502_v52 = vadd.f32 1.0, %v2472_v48  ;;  %2493 = vpow2.f32 %v1898_v41  ;;  %v1901_v53 = vmul.f32 -1.442695, %v1197_v46 }
 0x236   :  { %v2476_v54 = vpop.eup %2475  ;;  %v1688_v56 = vmul.f32 %v2610_v55, %v2474_v51  ;;  %2495 = vrcp.f32 %v1503_v49  ;;  %v1900_v57 = vmul.f32 -1.442695, %v1192_v50  ;;  %v2268_v58 = vpop.f32.mrb[50].mxu1 }
 0x237   :  { %v2478_v59 = vpop.eup %2477  ;;  %v1691_v61 = vmul.f32 %v2611_v60, %v2476_v54  ;;  %2497 = vrcp.f32 %v1502_v52  ;;  %v1207_v62 = vadd.f32 %v2268_v58, %v3049_v25  ;;  %v1201_v63 = vpop.f32.mrb[51].mxu1  ;;  %v2617_v52 = vld [vmem:[%s3497_s0 + $0x158] sm:$0xff] }
 0x238   :  { %v2480_v0 = vpop.eup %2479  ;;  %1752 = vst [vmem:[%s3501_s5 + $0x110] sm:$0xff] %v1688_v56  ;;  %v1505_v1 = vadd.f32 1.0, %v2478_v59  ;;  %2499 = vpow2.f32 %v1901_v53  ;;  %v1202_v2 = vadd.f32 %v3049_v25, %v1201_v63  ;;  %v2618_v56 = vld [vmem:[%s3497_s0 + $0x150] sm:$0xff] }
 0x239   :  { %v2482_v3 = vpop.eup %2481  ;;  %1755 = vst [vmem:[%s3501_s5 + $0x128] sm:$0xff] %v1691_v61  ;;  %v1504_v4 = vadd.f32 1.0, %v2480_v0  ;;  %2501 = vpow2.f32 %v1900_v57  ;;  %v1903_v5 = vmul.f32 -1.442695, %v1207_v62  ;;  %v2619_v61 = vld [vmem:[%s3500_s4] ss:$0 sm:$0xff] }
 0x23a   :  { %v2484_v6 = vpop.eup %2483  ;;  %v1690_v8 = vmul.f32 %v2612_v7, %v2482_v3  ;;  %2503 = vrcp.f32 %v1505_v1  ;;  %v1902_v9 = vmul.f32 -1.442695, %v1202_v2  ;;  %v2271_v10 = vpop.f32.mrb[52].mxu1 }
 0x23b   :  { %v2486_v11 = vpop.eup %2485  ;;  %v1693_v13 = vmul.f32 %v2613_v12, %v2484_v6  ;;  %2505 = vrcp.f32 %v1504_v4  ;;  %v1217_v14 = vadd.f32 %v2271_v10, %v3049_v25  ;;  %v1211_v15 = vpop.f32.mrb[53].mxu1  ;;  %v2620_v4 = vld [vmem:[%s3497_s0 + $0x168] sm:$0xff]  ;;  %v2621_v12 = vld [vmem:[%s3497_s0 + $0x160] sm:$0xff] }
 0x23c   :  { %v2488_v16 = vpop.eup %2487  ;;  %1754 = vst [vmem:[%s3501_s5 + $0x120] sm:$0xff] %v1690_v8  ;;  %v1507_v17 = vadd.f32 1.0, %v2486_v11  ;;  %2507 = vpow2.f32 %v1903_v5  ;;  %v1212_v18 = vadd.f32 %v3049_v25, %v1211_v15 }
 0x23d   :  { %v2490_v19 = vpop.eup %2489  ;;  %1757 = vst [vmem:[%s3501_s5 + $0x138] sm:$0xff] %v1693_v13  ;;  %v1692_v21 = vmul.f32 %v2614_v20, %v2488_v16  ;;  %2509 = vpow2.f32 %v1902_v9  ;;  %v1905_v22 = vmul.f32 -1.442695, %v1217_v14 }
 0x23e   :  { %v2492_v23 = vpop.eup %2491  ;;  %2511 = vrcp.f32 %v1507_v17  ;;  %v1506_v24 = vadd.f32 1.0, %v2490_v19  ;;  %v2274_v26 = vpop.f32.mrb[54].mxu1  ;;  %v1904_v29 = vmul.f32 -1.442695, %v1212_v18  ;;  %v2622_v17 = vld [vmem:[%s3497_s0 + $0x178] sm:$0xff] }
 0x23f   :  { %v2494_v27 = vpop.eup %2493  ;;  %1756 = vst [vmem:[%s3501_s5 + $0x130] sm:$0xff] %v1692_v21  ;;  %v1509_v28 = vadd.f32 1.0, %v2492_v23  ;;  %2513 = vpow2.f32 %v1905_v22  ;;  %v1227_v30 = vadd.f32 %v2274_v26, %v3049_v25  ;;  %v1221_v31 = vpop.f32.mrb[55].mxu1  ;;  %v2623_v21 = vld [vmem:[%s3497_s0 + $0x170] sm:$0xff] }
 0x240   :  { %v2496_v32 = vpop.eup %2495  ;;  %2515 = vrcp.f32 %v1506_v24  ;;  %v1508_v33 = vadd.f32 1.0, %v2494_v27  ;;  %v1222_v34 = vadd.f32 %v3049_v25, %v1221_v31 }
 0x241   :  { %v2498_v35 = vpop.eup %2497  ;;  %v1695_v37 = vmul.f32 %v2615_v36, %v2496_v32  ;;  %2517 = vrcp.f32 %v1509_v28  ;;  %v1907_v38 = vmul.f32 -1.442695, %v1227_v30 }
 0x242   :  { %v2500_v39 = vpop.eup %2499  ;;  %v1694_v41 = vmul.f32 %v2616_v40, %v2498_v35  ;;  %2519 = vrcp.f32 %v1508_v33  ;;  %v2277_v42 = vpop.f32.mrb[56].mxu1  ;;  %v1906_v45 = vmul.f32 -1.442695, %v1222_v34  ;;  %v2624_v34 = vld [vmem:[%s3497_s0 + $0x188] sm:$0xff] }
 0x243   :  { %v2502_v43 = vpop.eup %2501  ;;  %1759 = vst [vmem:[%s3501_s5 + $0x148] sm:$0xff] %v1695_v37  ;;  %v1511_v44 = vadd.f32 1.0, %v2500_v39  ;;  %2521 = vpow2.f32 %v1904_v29  ;;  %v1237_v46 = vadd.f32 %v2277_v42, %v3049_v25  ;;  %v1231_v47 = vpop.f32.mrb[57].mxu1 }
 0x244   :  { %v2504_v48 = vpop.eup %2503  ;;  %1758 = vst [vmem:[%s3501_s5 + $0x140] sm:$0xff] %v1694_v41  ;;  %v1510_v49 = vadd.f32 1.0, %v2502_v43  ;;  %2523 = vpow2.f32 %v1907_v38  ;;  %v1232_v50 = vadd.f32 %v3049_v25, %v1231_v47  ;;  %v2625_v38 = vld [vmem:[%s3497_s0 + $0x180] sm:$0xff]  ;;  %v2626_v47 = vld [vmem:[%s3497_s0 + $0x198] sm:$0xff] }
 0x245   :  { %v2506_v51 = vpop.eup %2505  ;;  %v1697_v53 = vmul.f32 %v2617_v52, %v2504_v48  ;;  %2525 = vrcp.f32 %v1511_v44  ;;  %v1909_v54 = vmul.f32 -1.442695, %v1237_v46 }
 0x246   :  { %v2508_v55 = vpop.eup %2507  ;;  %v1696_v57 = vmul.f32 %v2618_v56, %v2506_v51  ;;  %2527 = vrcp.f32 %v1510_v49  ;;  %v2280_v58 = vpop.f32.mrb[58].mxu1  ;;  %v1908_v60 = vmul.f32 -1.442695, %v1232_v50  ;;  %v2627_v50 = vld [vmem:[%s3497_s0 + $0x190] sm:$0xff] }
 0x247   :  { %v2510_v59 = vpop.eup %2509  ;;  %1761 = vst [vmem:[%s3501_s5 + $0x158] sm:$0xff] %v1697_v53  ;;  %v1513_v25 = vadd.f32 1.0, %v2508_v55  ;;  %2529 = vpow2.f32 %v1906_v45  ;;  %v1247_v62 = vadd.f32 %v2619_v61, %v2280_v58  ;;  %v1241_v63 = vpop.f32.mrb[59].mxu1  ;;  %v2628_v55 = vld [vmem:[%s3497_s0 + $0x1a8] sm:$0xff] }
 0x248   :  { %v2512_v0 = vpop.eup %2511  ;;  %1760 = vst [vmem:[%s3501_s5 + $0x150] sm:$0xff] %v1696_v57  ;;  %v1512_v1 = vadd.f32 1.0, %v2510_v59  ;;  %2531 = vpow2.f32 %v1909_v54  ;;  %v1242_v2 = vadd.f32 %v2619_v61, %v1241_v63  ;;  %v2629_v63 = vld [vmem:[%s3497_s0 + $0x1a0] sm:$0xff] }
 0x249   :  { %v2514_v3 = vpop.eup %2513  ;;  %v1699_v5 = vmul.f32 %v2620_v4, %v2512_v0  ;;  %2533 = vrcp.f32 %v1513_v25  ;;  %v1911_v6 = vmul.f32 -1.442695, %v1247_v62 }
 0x24a   :  { %v2516_v7 = vpop.eup %2515  ;;  %2535 = vrcp.f32 %v1512_v1  ;;  %v1515_v8 = vadd.f32 1.0, %v2514_v3  ;;  %v1910_v9 = vmul.f32 -1.442695, %v1242_v2  ;;  %v2283_v10 = vpop.f32.mrb[60].mxu1  ;;  %v2630_v2 = vld [vmem:[%s3497_s0 + $0x1b8] sm:$0xff] }
 0x24b   :  { %v2518_v11 = vpop.eup %2517  ;;  %1763 = vst [vmem:[%s3501_s5 + $0x168] sm:$0xff] %v1699_v5  ;;  %v1698_v13 = vmul.f32 %v2621_v12, %v2516_v7  ;;  %2537 = vpow2.f32 %v1908_v60  ;;  %v1257_v14 = vadd.f32 %v2619_v61, %v2283_v10  ;;  %v1251_v15 = vpop.f32.mrb[61].mxu1  ;;  %v2632_v12 = vld [vmem:[%s3497_s0 + $0x1c8] sm:$0xff] }
 0x24c   :  { %v2520_v16 = vpop.eup %2519  ;;  %v1701_v18 = vmul.f32 %v2622_v17, %v2518_v11  ;;  %2539 = vrcp.f32 %v1515_v8  ;;  %v1252_v19 = vadd.f32 %v2619_v61, %v1251_v15 }
 0x24d   :  { %v2522_v20 = vpop.eup %2521  ;;  %1762 = vst [vmem:[%s3501_s5 + $0x160] sm:$0xff] %v1698_v13  ;;  %v1700_v22 = vmul.f32 %v2623_v21, %v2520_v16  ;;  %2541 = vpow2.f32 %v1911_v6  ;;  %v1913_v23 = vmul.f32 -1.442695, %v1257_v14  ;;  %v2633_v16 = vld [vmem:[%s3497_s0 + $0x1c0] sm:$0xff] }
 0x24e   :  { %v2524_v24 = vpop.eup %2523  ;;  %1765 = vst [vmem:[%s3501_s5 + $0x178] sm:$0xff] %v1701_v18  ;;  %v1514_v26 = vadd.f32 1.0, %v2522_v20  ;;  %2543 = vpow2.f32 %v1910_v9  ;;  %v1912_v27 = vmul.f32 -1.442695, %v1252_v19  ;;  %v2286_v28 = vpop.f32.mrb[62].mxu1  ;;  %v2631_v9 = vld [vmem:[%s3497_s0 + $0x1b0] sm:$0xff] }
 0x24f   :  { %v2526_v29 = vpop.eup %2525  ;;  %1764 = vst [vmem:[%s3501_s5 + $0x170] sm:$0xff] %v1700_v22  ;;  %v1517_v30 = vadd.f32 1.0, %v2524_v24  ;;  %2545 = vpow2.f32 %v1913_v23  ;;  %v1267_v31 = vadd.f32 %v2619_v61, %v2286_v28  ;;  %v1261_v32 = vpop.f32.mrb[63].mxu1  ;;  %v2634_v20 = vld [vmem:[%s3497_s0 + $0x1d8] sm:$0xff]  ;;  %v2635_v23 = vld [vmem:[%s3497_s0 + $0x1d0] sm:$0xff] }
 0x250   :  { %v2528_v33 = vpop.eup %2527  ;;  %v1703_v35 = vmul.f32 %v2624_v34, %v2526_v29  ;;  %2547 = vrcp.f32 %v1514_v26  ;;  %v1262_v36 = vadd.f32 %v2619_v61, %v1261_v32  ;;  %v2636_v26 = vld [vmem:[%s3497_s0 + $0x1e8] sm:$0xff]  ;;  %v2638_v32 = vld [vmem:[%s3497_s0 + $0x1f8] sm:$0xff] }
 0x251   :  { %v2530_v37 = vpop.eup %2529  ;;  %v1702_v39 = vmul.f32 %v2625_v38, %v2528_v33  ;;  %2549 = vrcp.f32 %v1517_v30  ;;  %v1915_v40 = vmul.f32 -1.442695, %v1267_v31  ;;  %v2637_v30 = vld [vmem:[%s3497_s0 + $0x1e0] sm:$0xff] }
 0x252   :  { %v2532_v41 = vpop.eup %2531  ;;  %1767 = vst [vmem:[%s3501_s5 + $0x188] sm:$0xff] %v1703_v35  ;;  %v1516_v42 = vadd.f32 1.0, %v2530_v37  ;;  %2551 = vpow2.f32 %v1912_v27  ;;  %v1914_v43 = vmul.f32 -1.442695, %v1262_v36  ;;  %v2639_v35 = vld [vmem:[%s3497_s0 + $0x1f0] sm:$0xff] }
 0x253   :  { %v2534_v44 = vpop.eup %2533  ;;  %1766 = vst [vmem:[%s3501_s5 + $0x180] sm:$0xff] %v1702_v39  ;;  %v1519_v45 = vadd.f32 1.0, %v2532_v41  ;;  %2553 = vpow2.f32 %v1915_v40 }
 0x254   :  { %v2536_v46 = vpop.eup %2535  ;;  %v1705_v48 = vmul.f32 %v2626_v47, %v2534_v44  ;;  %2555 = vrcp.f32 %v1516_v42 }
 0x255   :  { %v2538_v49 = vpop.eup %2537  ;;  %v1704_v51 = vmul.f32 %v2627_v50, %v2536_v46  ;;  %2557 = vrcp.f32 %v1519_v45 }
 0x256   :  { %v2540_v52 = vpop.eup %2539  ;;  %1769 = vst [vmem:[%s3501_s5 + $0x198] sm:$0xff] %v1705_v48  ;;  %v1518_v53 = vadd.f32 1.0, %v2538_v49  ;;  %2559 = vpow2.f32 %v1914_v43 }
 0x257   :  { %v2542_v54 = vpop.eup %2541  ;;  %1768 = vst [vmem:[%s3501_s5 + $0x190] sm:$0xff] %v1704_v51  ;;  %v1707_v56 = vmul.f32 %v2628_v55, %v2540_v52 }
 0x258   :  { %v2544_v57 = vpop.eup %2543  ;;  %2561 = vrcp.f32 %v1518_v53  ;;  %v1521_v58 = vadd.f32 1.0, %v2542_v54 }
 0x259   :  { %v2546_v59 = vpop.eup %2545  ;;  %1771 = vst [vmem:[%s3501_s5 + $0x1a8] sm:$0xff] %v1707_v56  ;;  %v1520_v25 = vadd.f32 1.0, %v2544_v57 }
 0x25a   :  { %v2548_v60 = vpop.eup %2547  ;;  %2563 = vrcp.f32 %v1521_v58  ;;  %v1523_v61 = vadd.f32 1.0, %v2546_v59 }
 0x25b   :  { %v2550_v62 = vpop.eup %2549  ;;  %v1706_v0 = vmul.f32 %v2629_v63, %v2548_v60  ;;  %2565 = vrcp.f32 %v1520_v25 }
 0x25c   :  { %v2552_v1 = vpop.eup %2551  ;;  %v1709_v3 = vmul.f32 %v2630_v2, %v2550_v62  ;;  %2567 = vrcp.f32 %v1523_v61 }
 0x25d   :  { %v2554_v4 = vpop.eup %2553  ;;  %1770 = vst [vmem:[%s3501_s5 + $0x1a0] sm:$0xff] %v1706_v0  ;;  %v1522_v5 = vadd.f32 1.0, %v2552_v1 }
 0x25e   :  { %v2556_v6 = vpop.eup %2555  ;;  %1773 = vst [vmem:[%s3501_s5 + $0x1b8] sm:$0xff] %v1709_v3  ;;  %v1525_v7 = vadd.f32 1.0, %v2554_v4 }
 0x25f   :  { %v2558_v8 = vpop.eup %2557  ;;  %v1708_v10 = vmul.f32 %v2631_v9, %v2556_v6  ;;  %2569 = vrcp.f32 %v1522_v5 }
 0x260   :  { %v2560_v11 = vpop.eup %2559  ;;  %v1711_v13 = vmul.f32 %v2632_v12, %v2558_v8  ;;  %2571 = vrcp.f32 %v1525_v7 }
 0x261   :  { %1772 = vst [vmem:[%s3501_s5 + $0x1b0] sm:$0xff] %v1708_v10  ;;  %v1524_v14 = vadd.f32 1.0, %v2560_v11 }
 0x262   :  { %v2562_v15 = vpop.eup %2561  ;;  %1775 = vst [vmem:[%s3501_s5 + $0x1c8] sm:$0xff] %v1711_v13 }
 0x263   :  { %v1710_v17 = vmul.f32 %v2633_v16, %v2562_v15  ;;  %2573 = vrcp.f32 %v1524_v14 }
 0x264   :  { %v2564_v18 = vpop.eup %2563 }
 0x265   :  { %v2566_v19 = vpop.eup %2565  ;;  %1774 = vst [vmem:[%s3501_s5 + $0x1c0] sm:$0xff] %v1710_v17  ;;  %v1713_v21 = vmul.f32 %v2634_v20, %v2564_v18 }
 0x266   :  { %v2568_v22 = vpop.eup %2567  ;;  %v1712_v24 = vmul.f32 %v2635_v23, %v2566_v19 }
 0x267   :  { %1777 = vst [vmem:[%s3501_s5 + $0x1d8] sm:$0xff] %v1713_v21  ;;  %v1715_v27 = vmul.f32 %v2636_v26, %v2568_v22 }
 0x268   :  { %1776 = vst [vmem:[%s3501_s5 + $0x1d0] sm:$0xff] %v1712_v24 }
 0x269   :  { %v2570_v28 = vpop.eup %2569  ;;  %1779 = vst [vmem:[%s3501_s5 + $0x1e8] sm:$0xff] %v1715_v27 }
 0x26a   :  { %v2572_v29 = vpop.eup %2571  ;;  %v1714_v31 = vmul.f32 %v2637_v30, %v2570_v28 }
 0x26b   :  { %v1717_v33 = vmul.f32 %v2638_v32, %v2572_v29 }
 0x26c   :  { %1778 = vst [vmem:[%s3501_s5 + $0x1e0] sm:$0xff] %v1714_v31 }
 0x26d   :  { %v2574_v34 = vpop.eup %2573  ;;  %1781 = vst [vmem:[%s3501_s5 + $0x1f8] sm:$0xff] %v1717_v33 }
 0x26e   :  { %v1716_v36 = vmul.f32 %v2639_v35, %v2574_v34 }
 0x270   :  { %1780 = vst [vmem:[%s3501_s5 + $0x1f0] sm:$0xff] %v1716_v36 }

</bundles_post_ra>
